<compile_context>
chip_gen: v6e
topology: v6e:2x2x1
jax: 0.10.0
libtpu: 0.0.40
codegen_flags: <defaults>
</compile_context>

<pallas_src>
import numpy as np
import jax
import jax.numpy as jnp
from jax.experimental import pallas as pl
from jax.experimental.pallas import tpu as pltpu


# ----------------------------------------------------------------------------
# Host-side planning: fold the W-gather/stride/pad into the conv weights.
# ----------------------------------------------------------------------------
def _conv_out(sz, stride):
    # Conv2dSame with k=3, dilation=1: symmetric (1, 1) padding both sides.
    return (sz - 1) // stride + 1


def _plan_layers(params, h, w, strides):
    """Per-layer static config + fused operands.

    A layer (stride s) is computed as
        out[b, i, j*Cout+co] = sum_kh  X_kh[b, i, :] @ M_kh[:, j*Cout+co]
    where X_kh[b, i, :] is padded input row (s*i + kh - 1) laid out as
    (W*Cin) lanes, and M_kh holds w[kh, kw, ci, co] at row (s*j+kw-1)*Cin+ci,
    column j*Cout+co (zero when the kw tap falls into the SAME zero padding).
    Only the H gather remains in-kernel (strided reads of a padded scratch).
    """
    cfgs, operands = [], []
    for (wgt, b), s in zip(params, strides):
        wnp = np.asarray(wgt, np.float32)              # (3, 3, Cin, Cout)
        cin, cout = wnp.shape[2], wnp.shape[3]
        ho, wo = _conv_out(h, s), _conv_out(w, s)

        # Keep only kh taps that touch at least one real (non-padded) row.
        taps, needs_pad_rows = [], False
        for kh in range(3):
            rows = [s * i + kh - 1 for i in range(ho)]
            if any(0 <= r < h for r in rows):
                taps.append(kh)
                needs_pad_rows |= any(not (0 <= r < h) for r in rows)
        use_scratch = (s != 1) or needs_pad_rows       # value-slice path if False

        mats = []
        for kh in taps:
            m = np.zeros((w * cin, wo * cout), np.float32)
            for j in range(wo):
                for kw in range(3):
                    wi = s * j + kw - 1
                    if 0 <= wi < w:
                        m[wi * cin:(wi + 1) * cin,
                          j * cout:(j + 1) * cout] = wnp[kh, kw]
            mats.append(m)
        m_stack = np.stack(mats)                        # (T, W*Cin, Wo*Cout)

        bias_row = np.tile(np.asarray(b, np.float32).reshape(-1), wo)
        bias_row = bias_row.reshape(1, 1, wo * cout)

        if use_scratch:
            max_read = max(kh + (ho - 1) * s for kh in taps)
            h_pad = max(h + 1, max_read + 1)            # top pad row at index 0
        else:
            h_pad = 0

        cfgs.append(dict(h=h, wc=w * cin, h_pad=h_pad, ho=ho, n=wo * cout,
                         s=s, taps=tuple(taps), use_scratch=use_scratch))
        operands.append((jnp.asarray(m_stack, jnp.bfloat16),
                         jnp.asarray(bias_row, jnp.float32)))
        h, w = ho, wo
    return cfgs, operands, (h, w)


# ----------------------------------------------------------------------------
# Pallas kernel factory: one grid step processes `bb` samples end-to-end.
# ----------------------------------------------------------------------------
def _make_kernel(bb, cfgs):
    n_layers = len(cfgs)
    scratch_idx, si = [], 0
    for c in cfgs:
        scratch_idx.append(si if c['use_scratch'] else None)
        si += int(c['use_scratch'])

    def kernel(x_ref, *refs):
        const_refs = refs[:2 * n_layers]
        out_ref = refs[2 * n_layers]
        scratch_refs = refs[2 * n_layers + 1:]

        a = x_ref[...] - 0.5                            # (bb, H, W*Cin) f32
        for l, cfg in enumerate(cfgs):
            m_ref, b_ref = const_refs[2 * l], const_refs[2 * l + 1]
            h, wc, hp = cfg['h'], cfg['wc'], cfg['h_pad']
            ho, nn, s, taps = cfg['ho'], cfg['n'], cfg['s'], cfg['taps']

            if cfg['use_scratch']:
                # Zero-padded copy of the activation (H padding only; the W
                # padding lives in the fused weight matrices).
                pad = scratch_refs[scratch_idx[l]]
                pad[:, 0:1, :] = jnp.zeros((bb, 1, wc), jnp.float32)
                if hp > h + 1:
                    pad[:, h + 1:hp, :] = jnp.zeros((bb, hp - h - 1, wc),
                                                    jnp.float32)
                pad[:, 1:h + 1, :] = a

            acc = jnp.zeros((bb, ho, nn), jnp.float32)
            for t, kh in enumerate(taps):               # static unroll, <=3 taps
                if cfg['use_scratch']:
                    if s == 1:
                        rows = pad[:, pl.ds(kh, ho), :]
                    else:
                        rows = pad[:, pl.ds(kh, ho, stride=s), :]
                else:
                    rows = a[:, kh - 1:kh - 1 + ho, :]  # all rows in range
                xk = rows.astype(jnp.bfloat16)          # MXU operand
                mb = jnp.broadcast_to(m_ref[t], (bb,) + tuple(m_ref.shape[1:]))
                acc = acc + jnp.einsum('bhk,bkn->bhn', xk, mb,
                                       preferred_element_type=jnp.float32)
            a = jnp.maximum(acc + b_ref[...], 0.0)      # f32 bias + ReLU

        # Partial sum over this step's samples; lane-dense (1,1,128) store.
        tot = jnp.sum(a, axis=(0, 1, 2), keepdims=True)
        out_ref[...] = jnp.broadcast_to(tot, (1, 1, 128))

    return kernel


# ----------------------------------------------------------------------------
# Public entry point: replicates Discriminator.forward
# ----------------------------------------------------------------------------
def discriminator_forward(image_nchw, params, strides=(2, 2, 2, 2, 1)):
    image_nchw = image_nchw.astype(jnp.float32)
    n, c, h, w = image_nchw.shape
    cfgs, operands, (ho_f, wo_f) = _plan_layers(params, h, w, strides)
    cout_f = params[-1][0].shape[-1]

    # Samples per grid step (whole batch in one step for small batches).
    bb = max(d for d in range(1, min(n, 8) + 1) if n % d == 0)
    steps = n // bb

    # NCHW -> (N, H, W*C): channels (and W) ride the lane axis.
    x = jnp.transpose(image_nchw, (0, 2, 3, 1)).reshape(n, h, w * c)

    flat_ops = [arr for pair in operands for arr in pair]
    in_specs = [pl.BlockSpec((bb, h, w * c), lambda i: (i, 0, 0))]
    # Constant operands (fused weights / bias rows): full-array blocks.  They
    # are tiny here; single-buffering (pl.Buffered(1)) would halve their VMEM
    # but is skipped for lowering robustness.
    in_specs += [pl.BlockSpec(arr.shape, lambda i: (0, 0, 0)) for arr in flat_ops]

    scratch_shapes = [pltpu.VMEM((bb, cfg['h_pad'], cfg['wc']), jnp.float32)
                      for cfg in cfgs if cfg['use_scratch']]

    partial = pl.pallas_call(
        _make_kernel(bb, cfgs),
        out_shape=jax.ShapeDtypeStruct((steps, 1, 128), jnp.float32),
        grid=(steps,),
        in_specs=in_specs,
        out_specs=pl.BlockSpec((1, 1, 128), lambda i: (i, 0, 0)),
        scratch_shapes=scratch_shapes,
        compiler_params=pltpu.CompilerParams(
            dimension_semantics=("parallel",)),
    )(x, *flat_ops)

    count = n * ho_f * wo_f * cout_f                    # = N*1*1*1 here
    return jnp.sum(partial[:, 0, 0]) / count            # torch.mean(x)


# ----------------------------------------------------------------------------
# Deterministic parameter init (mimics PyTorch Conv2d default init bounds)
# ----------------------------------------------------------------------------
def init_params(key, in_channel=3):
    channels = [(in_channel, 8), (8, 16), (16, 32), (32, 64), (64, 1)]
    params = []
    for cin, cout in channels:
        key, kw, kb = jax.random.split(key, 3)
        bound = 1.0 / np.sqrt(cin * 9)
        wgt = jax.random.uniform(kw, (3, 3, cin, cout), jnp.float32, -bound, bound)
        b = jax.random.uniform(kb, (1, cout), jnp.float32, -bound, bound)
        params.append((wgt, b))
    return params


# ----------------------------------------------------------------------------
# Pure-JAX references (lax.conv) used only to sanity-check the kernel
# ----------------------------------------------------------------------------
def _reference_forward(image_nchw, params, strides=(2, 2, 2, 2, 1),
                       mxu_dtype=None):
    """mxu_dtype=jnp.bfloat16 mirrors the kernel's mixed precision exactly."""
    x = jnp.transpose(image_nchw.astype(jnp.float32), (0, 2, 3, 1)) - 0.5
    for (wgt, b), s in zip(params, strides):
        lhs, rhs = x, wgt
        if mxu_dtype is not None:
            lhs, rhs = lhs.astype(mxu_dtype), rhs.astype(mxu_dtype)
        y = jax.lax.conv_general_dilated(
            lhs, rhs, window_strides=(s, s), padding=((1, 1), (1, 1)),
            dimension_numbers=("NHWC", "HWIO", "NHWC"),
            preferred_element_type=jnp.float32)
        x = jnp.maximum(y + b.reshape(1, 1, 1, -1), 0.0)
    return jnp.mean(x)


if __name__ == "__main__":
    key = jax.random.PRNGKey(0)
    k_img, k_par = jax.random.split(key)

    # Small input consistent with the module: NCHW, 3 channels, 16x16 spatial.
    image = jax.random.uniform(k_img, (2, 3, 16, 16), jnp.float32)
    params = init_params(k_par, in_channel=3)

    out = jax.block_until_ready(discriminator_forward(image, params))

    # Tight check vs. a reference using the same bf16-operand / f32-accum
    # mixed precision as the kernel.
    ref_bf16 = jax.block_until_ready(
        _reference_forward(image, params, mxu_dtype=jnp.bfloat16))
    assert jnp.allclose(out, ref_bf16, rtol=1e-3, atol=1e-4), (out, ref_bf16)

    # Loose check vs. the full-f32 module semantics (bf16 rounding headroom).
    ref_f32 = jax.block_until_ready(_reference_forward(image, params))
    assert jnp.allclose(out, ref_f32, rtol=5e-2, atol=1e-2), (out, ref_f32)

    print("KERNEL_OK")
</pallas_src>

<mosaic_0001>
module attributes {stable_mosaic.version = 11 : i64} {
  func.func @kernel(%arg0: i32, %arg1: memref<2x16x48xf32, #tpu.memory_space<vmem>>, %arg2: memref<3x48x64xbf16, #tpu.memory_space<vmem>>, %arg3: memref<1x1x64xf32, #tpu.memory_space<vmem>>, %arg4: memref<3x64x64xbf16, #tpu.memory_space<vmem>>, %arg5: memref<1x1x64xf32, #tpu.memory_space<vmem>>, %arg6: memref<3x64x64xbf16, #tpu.memory_space<vmem>>, %arg7: memref<1x1x64xf32, #tpu.memory_space<vmem>>, %arg8: memref<2x64x64xbf16, #tpu.memory_space<vmem>>, %arg9: memref<1x1x64xf32, #tpu.memory_space<vmem>>, %arg10: memref<1x64x1xbf16, #tpu.memory_space<vmem>>, %arg11: memref<1x1x1xf32, #tpu.memory_space<vmem>>, %arg12: memref<1x1x128xf32, #tpu.memory_space<vmem>>, %arg13: memref<2x17x48xf32, #tpu.memory_space<vmem>>, %arg14: memref<2x9x64xf32, #tpu.memory_space<vmem>>, %arg15: memref<2x5x64xf32, #tpu.memory_space<vmem>>, %arg16: memref<2x3x64xf32, #tpu.memory_space<vmem>>) attributes {dimension_semantics = [#tpu.dimension_semantics<parallel>], iteration_bounds = array<i64: 1>, scalar_prefetch = 0 : i64, scratch_operands = 4 : i64, tpu.core_type = #tpu.core_type<tc>, window_params = [{transform_indices = @transform_0, window_bounds = array<i64: 2, 16, 48>}, {pipeline_mode = #tpu.pipeline_mode<synchronous>, transform_indices = @transform_1, window_bounds = array<i64: 3, 48, 64>}, {pipeline_mode = #tpu.pipeline_mode<synchronous>, transform_indices = @transform_2, window_bounds = array<i64: 1, 1, 64>}, {pipeline_mode = #tpu.pipeline_mode<synchronous>, transform_indices = @transform_3, window_bounds = array<i64: 3, 64, 64>}, {pipeline_mode = #tpu.pipeline_mode<synchronous>, transform_indices = @transform_4, window_bounds = array<i64: 1, 1, 64>}, {pipeline_mode = #tpu.pipeline_mode<synchronous>, transform_indices = @transform_5, window_bounds = array<i64: 3, 64, 64>}, {pipeline_mode = #tpu.pipeline_mode<synchronous>, transform_indices = @transform_6, window_bounds = array<i64: 1, 1, 64>}, {pipeline_mode = #tpu.pipeline_mode<synchronous>, transform_indices = @transform_7, window_bounds = array<i64: 2, 64, 64>}, {pipeline_mode = #tpu.pipeline_mode<synchronous>, transform_indices = @transform_8, window_bounds = array<i64: 1, 1, 64>}, {pipeline_mode = #tpu.pipeline_mode<synchronous>, transform_indices = @transform_9, window_bounds = array<i64: 1, 64, 1>}, {pipeline_mode = #tpu.pipeline_mode<synchronous>, transform_indices = @transform_10, window_bounds = array<i64: 1, 1, 1>}, {transform_indices = @transform_11, window_bounds = array<i64: 1, 1, 128>}]} {
    %c0 = arith.constant 0 : index
    %c0_0 = arith.constant 0 : index
    %c0_1 = arith.constant 0 : index
    %0 = vector.load %arg1[%c0, %c0_0, %c0_1] : memref<2x16x48xf32, #tpu.memory_space<vmem>>, vector<2x16x48xf32>
    %cst = arith.constant 5.000000e-01 : f32
    %1 = vector.broadcast %cst : f32 to vector<2x16x48xf32>
    %2 = arith.subf %0, %1 : vector<2x16x48xf32>
    %cst_2 = arith.constant 0.000000e+00 : f32
    %3 = vector.broadcast %cst_2 : f32 to vector<2x1x48xf32>
    %c0_3 = arith.constant 0 : index
    %c0_4 = arith.constant 0 : index
    %c0_5 = arith.constant 0 : index
    %4 = vector.load %arg13[%c0_3, %c0_4, %c0_5] : memref<2x17x48xf32, #tpu.memory_space<vmem>>, vector<2x1x48xf32>
    tpu.vector_store %arg13[%c0_3, %c0_4, %c0_5], %3 {strides = array<i32>} : memref<2x17x48xf32, #tpu.memory_space<vmem>>, vector<2x1x48xf32>,
    %c0_6 = arith.constant 0 : index
    %c1 = arith.constant 1 : index
    %c0_7 = arith.constant 0 : index
    %5 = vector.load %arg13[%c0_6, %c1, %c0_7] : memref<2x17x48xf32, #tpu.memory_space<vmem>>, vector<2x16x48xf32>
    tpu.vector_store %arg13[%c0_6, %c1, %c0_7], %2 {strides = array<i32>} : memref<2x17x48xf32, #tpu.memory_space<vmem>>, vector<2x16x48xf32>,
    %cst_8 = arith.constant 0.000000e+00 : f32
    %6 = vector.broadcast %cst_8 : f32 to vector<2x8x64xf32>
    %c0_9 = arith.constant 0 : index
    %c0_10 = arith.constant 0 : index
    %c0_11 = arith.constant 0 : index
    %7 = tpu.strided_load %arg13[%c0_9, %c0_10, %c0_11] {strides = array<i32: 1, 2, 1>} : memref<2x17x48xf32, #tpu.memory_space<vmem>>, vector<2x8x48xf32>
    %8 = arith.truncf %7 : vector<2x8x48xf32> to vector<2x8x48xbf16>
    %c0_12 = arith.constant 0 : index
    %c0_13 = arith.constant 0 : index
    %c0_14 = arith.constant 0 : index
    %9 = vector.load %arg2[%c0_12, %c0_13, %c0_14] : memref<3x48x64xbf16, #tpu.memory_space<vmem>>, vector<1x48x64xbf16>
    %10 = vector.shape_cast %9 : vector<1x48x64xbf16> to vector<48x64xbf16>
    %11 = vector.shape_cast %10 : vector<48x64xbf16> to vector<1x48x64xbf16>
    %12 = vector.broadcast %11 : vector<1x48x64xbf16> to vector<2x48x64xbf16>
    "tpu.trace_start"() <{level = 10 : i32, message = "bhk,bkn->bhn"}> : () -> ()
    %cst_15 = arith.constant dense<0.000000e+00> : vector<2x8x64xf32>
    %13 = tpu.matmul %8, %12, %cst_15 {dimension_numbers = #tpu.dot_dimension_numbers<[2], [1], [1], [2], [0, 0, 0, 1, 1, 2], [0], [0]>} : vector<2x8x48xbf16>, vector<2x48x64xbf16>, vector<2x8x64xf32> -> vector<2x8x64xf32>
    "tpu.trace_stop"() : () -> ()
    %14 = arith.addf %6, %13 : vector<2x8x64xf32>
    %c0_16 = arith.constant 0 : index
    %c1_17 = arith.constant 1 : index
    %c0_18 = arith.constant 0 : index
    %15 = tpu.strided_load %arg13[%c0_16, %c1_17, %c0_18] {strides = array<i32: 1, 2, 1>} : memref<2x17x48xf32, #tpu.memory_space<vmem>>, vector<2x8x48xf32>
    %16 = arith.truncf %15 : vector<2x8x48xf32> to vector<2x8x48xbf16>
    %c1_19 = arith.constant 1 : index
    %c0_20 = arith.constant 0 : index
    %c0_21 = arith.constant 0 : index
    %17 = vector.load %arg2[%c1_19, %c0_20, %c0_21] : memref<3x48x64xbf16, #tpu.memory_space<vmem>>, vector<1x48x64xbf16>
    %18 = vector.shape_cast %17 : vector<1x48x64xbf16> to vector<48x64xbf16>
    %19 = vector.shape_cast %18 : vector<48x64xbf16> to vector<1x48x64xbf16>
    %20 = vector.broadcast %19 : vector<1x48x64xbf16> to vector<2x48x64xbf16>
    "tpu.trace_start"() <{level = 10 : i32, message = "bhk,bkn->bhn"}> : () -> ()
    %cst_22 = arith.constant dense<0.000000e+00> : vector<2x8x64xf32>
    %21 = tpu.matmul %16, %20, %cst_22 {dimension_numbers = #tpu.dot_dimension_numbers<[2], [1], [1], [2], [0, 0, 0, 1, 1, 2], [0], [0]>} : vector<2x8x48xbf16>, vector<2x48x64xbf16>, vector<2x8x64xf32> -> vector<2x8x64xf32>
    "tpu.trace_stop"() : () -> ()
    %22 = arith.addf %14, %21 : vector<2x8x64xf32>
    %c0_23 = arith.constant 0 : index
    %c2 = arith.constant 2 : index
    %c0_24 = arith.constant 0 : index
    %23 = tpu.strided_load %arg13[%c0_23, %c2, %c0_24] {strides = array<i32: 1, 2, 1>} : memref<2x17x48xf32, #tpu.memory_space<vmem>>, vector<2x8x48xf32>
    %24 = arith.truncf %23 : vector<2x8x48xf32> to vector<2x8x48xbf16>
    %c2_25 = arith.constant 2 : index
    %c0_26 = arith.constant 0 : index
    %c0_27 = arith.constant 0 : index
    %25 = vector.load %arg2[%c2_25, %c0_26, %c0_27] : memref<3x48x64xbf16, #tpu.memory_space<vmem>>, vector<1x48x64xbf16>
    %26 = vector.shape_cast %25 : vector<1x48x64xbf16> to vector<48x64xbf16>
    %27 = vector.shape_cast %26 : vector<48x64xbf16> to vector<1x48x64xbf16>
    %28 = vector.broadcast %27 : vector<1x48x64xbf16> to vector<2x48x64xbf16>
    "tpu.trace_start"() <{level = 10 : i32, message = "bhk,bkn->bhn"}> : () -> ()
    %cst_28 = arith.constant dense<0.000000e+00> : vector<2x8x64xf32>
    %29 = tpu.matmul %24, %28, %cst_28 {dimension_numbers = #tpu.dot_dimension_numbers<[2], [1], [1], [2], [0, 0, 0, 1, 1, 2], [0], [0]>} : vector<2x8x48xbf16>, vector<2x48x64xbf16>, vector<2x8x64xf32> -> vector<2x8x64xf32>
    "tpu.trace_stop"() : () -> ()
    %30 = arith.addf %22, %29 : vector<2x8x64xf32>
    %c0_29 = arith.constant 0 : index
    %c0_30 = arith.constant 0 : index
    %c0_31 = arith.constant 0 : index
    %31 = vector.load %arg3[%c0_29, %c0_30, %c0_31] : memref<1x1x64xf32, #tpu.memory_space<vmem>>, vector<1x1x64xf32>
    %32 = vector.broadcast %31 : vector<1x1x64xf32> to vector<2x8x64xf32>
    %33 = arith.addf %30, %32 : vector<2x8x64xf32>
    %cst_32 = arith.constant 0.000000e+00 : f32
    %34 = vector.broadcast %cst_32 : f32 to vector<2x8x64xf32>
    %35 = arith.maximumf %33, %34 : vector<2x8x64xf32>
    %cst_33 = arith.constant 0.000000e+00 : f32
    %36 = vector.broadcast %cst_33 : f32 to vector<2x1x64xf32>
    %c0_34 = arith.constant 0 : index
    %c0_35 = arith.constant 0 : index
    %c0_36 = arith.constant 0 : index
    %37 = vector.load %arg14[%c0_34, %c0_35, %c0_36] : memref<2x9x64xf32, #tpu.memory_space<vmem>>, vector<2x1x64xf32>
    tpu.vector_store %arg14[%c0_34, %c0_35, %c0_36], %36 {strides = array<i32>} : memref<2x9x64xf32, #tpu.memory_space<vmem>>, vector<2x1x64xf32>,
    %c0_37 = arith.constant 0 : index
    %c1_38 = arith.constant 1 : index
    %c0_39 = arith.constant 0 : index
    %38 = vector.load %arg14[%c0_37, %c1_38, %c0_39] : memref<2x9x64xf32, #tpu.memory_space<vmem>>, vector<2x8x64xf32>
    tpu.vector_store %arg14[%c0_37, %c1_38, %c0_39], %35 {strides = array<i32>} : memref<2x9x64xf32, #tpu.memory_space<vmem>>, vector<2x8x64xf32>,
    %cst_40 = arith.constant 0.000000e+00 : f32
    %39 = vector.broadcast %cst_40 : f32 to vector<2x4x64xf32>
    %c0_41 = arith.constant 0 : index
    %c0_42 = arith.constant 0 : index
    %c0_43 = arith.constant 0 : index
    %40 = tpu.strided_load %arg14[%c0_41, %c0_42, %c0_43] {strides = array<i32: 1, 2, 1>} : memref<2x9x64xf32, #tpu.memory_space<vmem>>, vector<2x4x64xf32>
    %41 = arith.truncf %40 : vector<2x4x64xf32> to vector<2x4x64xbf16>
    %c0_44 = arith.constant 0 : index
    %c0_45 = arith.constant 0 : index
    %c0_46 = arith.constant 0 : index
    %42 = vector.load %arg4[%c0_44, %c0_45, %c0_46] : memref<3x64x64xbf16, #tpu.memory_space<vmem>>, vector<1x64x64xbf16>
    %43 = vector.shape_cast %42 : vector<1x64x64xbf16> to vector<64x64xbf16>
    %44 = vector.shape_cast %43 : vector<64x64xbf16> to vector<1x64x64xbf16>
    %45 = vector.broadcast %44 : vector<1x64x64xbf16> to vector<2x64x64xbf16>
    "tpu.trace_start"() <{level = 10 : i32, message = "bhk,bkn->bhn"}> : () -> ()
    %cst_47 = arith.constant dense<0.000000e+00> : vector<2x4x64xf32>
    %46 = tpu.matmul %41, %45, %cst_47 {dimension_numbers = #tpu.dot_dimension_numbers<[2], [1], [1], [2], [0, 0, 0, 1, 1, 2], [0], [0]>} : vector<2x4x64xbf16>, vector<2x64x64xbf16>, vector<2x4x64xf32> -> vector<2x4x64xf32>
    "tpu.trace_stop"() : () -> ()
    %47 = arith.addf %39, %46 : vector<2x4x64xf32>
    %c0_48 = arith.constant 0 : index
    %c1_49 = arith.constant 1 : index
    %c0_50 = arith.constant 0 : index
    %48 = tpu.strided_load %arg14[%c0_48, %c1_49, %c0_50] {strides = array<i32: 1, 2, 1>} : memref<2x9x64xf32, #tpu.memory_space<vmem>>, vector<2x4x64xf32>
    %49 = arith.truncf %48 : vector<2x4x64xf32> to vector<2x4x64xbf16>
    %c1_51 = arith.constant 1 : index
    %c0_52 = arith.constant 0 : index
    %c0_53 = arith.constant 0 : index
    %50 = vector.load %arg4[%c1_51, %c0_52, %c0_53] : memref<3x64x64xbf16, #tpu.memory_space<vmem>>, vector<1x64x64xbf16>
    %51 = vector.shape_cast %50 : vector<1x64x64xbf16> to vector<64x64xbf16>
    %52 = vector.shape_cast %51 : vector<64x64xbf16> to vector<1x64x64xbf16>
    %53 = vector.broadcast %52 : vector<1x64x64xbf16> to vector<2x64x64xbf16>
    "tpu.trace_start"() <{level = 10 : i32, message = "bhk,bkn->bhn"}> : () -> ()
    %cst_54 = arith.constant dense<0.000000e+00> : vector<2x4x64xf32>
    %54 = tpu.matmul %49, %53, %cst_54 {dimension_numbers = #tpu.dot_dimension_numbers<[2], [1], [1], [2], [0, 0, 0, 1, 1, 2], [0], [0]>} : vector<2x4x64xbf16>, vector<2x64x64xbf16>, vector<2x4x64xf32> -> vector<2x4x64xf32>
    "tpu.trace_stop"() : () -> ()
    %55 = arith.addf %47, %54 : vector<2x4x64xf32>
    %c0_55 = arith.constant 0 : index
    %c2_56 = arith.constant 2 : index
    %c0_57 = arith.constant 0 : index
    %56 = tpu.strided_load %arg14[%c0_55, %c2_56, %c0_57] {strides = array<i32: 1, 2, 1>} : memref<2x9x64xf32, #tpu.memory_space<vmem>>, vector<2x4x64xf32>
    %57 = arith.truncf %56 : vector<2x4x64xf32> to vector<2x4x64xbf16>
    %c2_58 = arith.constant 2 : index
    %c0_59 = arith.constant 0 : index
    %c0_60 = arith.constant 0 : index
    %58 = vector.load %arg4[%c2_58, %c0_59, %c0_60] : memref<3x64x64xbf16, #tpu.memory_space<vmem>>, vector<1x64x64xbf16>
    %59 = vector.shape_cast %58 : vector<1x64x64xbf16> to vector<64x64xbf16>
    %60 = vector.shape_cast %59 : vector<64x64xbf16> to vector<1x64x64xbf16>
    %61 = vector.broadcast %60 : vector<1x64x64xbf16> to vector<2x64x64xbf16>
    "tpu.trace_start"() <{level = 10 : i32, message = "bhk,bkn->bhn"}> : () -> ()
    %cst_61 = arith.constant dense<0.000000e+00> : vector<2x4x64xf32>
    %62 = tpu.matmul %57, %61, %cst_61 {dimension_numbers = #tpu.dot_dimension_numbers<[2], [1], [1], [2], [0, 0, 0, 1, 1, 2], [0], [0]>} : vector<2x4x64xbf16>, vector<2x64x64xbf16>, vector<2x4x64xf32> -> vector<2x4x64xf32>
    "tpu.trace_stop"() : () -> ()
    %63 = arith.addf %55, %62 : vector<2x4x64xf32>
    %c0_62 = arith.constant 0 : index
    %c0_63 = arith.constant 0 : index
    %c0_64 = arith.constant 0 : index
    %64 = vector.load %arg5[%c0_62, %c0_63, %c0_64] : memref<1x1x64xf32, #tpu.memory_space<vmem>>, vector<1x1x64xf32>
    %65 = vector.broadcast %64 : vector<1x1x64xf32> to vector<2x4x64xf32>
    %66 = arith.addf %63, %65 : vector<2x4x64xf32>
    %cst_65 = arith.constant 0.000000e+00 : f32
    %67 = vector.broadcast %cst_65 : f32 to vector<2x4x64xf32>
    %68 = arith.maximumf %66, %67 : vector<2x4x64xf32>
    %cst_66 = arith.constant 0.000000e+00 : f32
    %69 = vector.broadcast %cst_66 : f32 to vector<2x1x64xf32>
    %c0_67 = arith.constant 0 : index
    %c0_68 = arith.constant 0 : index
    %c0_69 = arith.constant 0 : index
    %70 = vector.load %arg15[%c0_67, %c0_68, %c0_69] : memref<2x5x64xf32, #tpu.memory_space<vmem>>, vector<2x1x64xf32>
    tpu.vector_store %arg15[%c0_67, %c0_68, %c0_69], %69 {strides = array<i32>} : memref<2x5x64xf32, #tpu.memory_space<vmem>>, vector<2x1x64xf32>,
    %c0_70 = arith.constant 0 : index
    %c1_71 = arith.constant 1 : index
    %c0_72 = arith.constant 0 : index
    %71 = vector.load %arg15[%c0_70, %c1_71, %c0_72] : memref<2x5x64xf32, #tpu.memory_space<vmem>>, vector<2x4x64xf32>
    tpu.vector_store %arg15[%c0_70, %c1_71, %c0_72], %68 {strides = array<i32>} : memref<2x5x64xf32, #tpu.memory_space<vmem>>, vector<2x4x64xf32>,
    %cst_73 = arith.constant 0.000000e+00 : f32
    %72 = vector.broadcast %cst_73 : f32 to vector<2x2x64xf32>
    %c0_74 = arith.constant 0 : index
    %c0_75 = arith.constant 0 : index
    %c0_76 = arith.constant 0 : index
    %73 = tpu.strided_load %arg15[%c0_74, %c0_75, %c0_76] {strides = array<i32: 1, 2, 1>} : memref<2x5x64xf32, #tpu.memory_space<vmem>>, vector<2x2x64xf32>
    %74 = arith.truncf %73 : vector<2x2x64xf32> to vector<2x2x64xbf16>
    %c0_77 = arith.constant 0 : index
    %c0_78 = arith.constant 0 : index
    %c0_79 = arith.constant 0 : index
    %75 = vector.load %arg6[%c0_77, %c0_78, %c0_79] : memref<3x64x64xbf16, #tpu.memory_space<vmem>>, vector<1x64x64xbf16>
    %76 = vector.shape_cast %75 : vector<1x64x64xbf16> to vector<64x64xbf16>
    %77 = vector.shape_cast %76 : vector<64x64xbf16> to vector<1x64x64xbf16>
    %78 = vector.broadcast %77 : vector<1x64x64xbf16> to vector<2x64x64xbf16>
    "tpu.trace_start"() <{level = 10 : i32, message = "bhk,bkn->bhn"}> : () -> ()
    %cst_80 = arith.constant dense<0.000000e+00> : vector<2x2x64xf32>
    %79 = tpu.matmul %74, %78, %cst_80 {dimension_numbers = #tpu.dot_dimension_numbers<[2], [1], [1], [2], [0, 0, 0, 1, 1, 2], [0], [0]>} : vector<2x2x64xbf16>, vector<2x64x64xbf16>, vector<2x2x64xf32> -> vector<2x2x64xf32>
    "tpu.trace_stop"() : () -> ()
    %80 = arith.addf %72, %79 : vector<2x2x64xf32>
    %c0_81 = arith.constant 0 : index
    %c1_82 = arith.constant 1 : index
    %c0_83 = arith.constant 0 : index
    %81 = tpu.strided_load %arg15[%c0_81, %c1_82, %c0_83] {strides = array<i32: 1, 2, 1>} : memref<2x5x64xf32, #tpu.memory_space<vmem>>, vector<2x2x64xf32>
    %82 = arith.truncf %81 : vector<2x2x64xf32> to vector<2x2x64xbf16>
    %c1_84 = arith.constant 1 : index
    %c0_85 = arith.constant 0 : index
    %c0_86 = arith.constant 0 : index
    %83 = vector.load %arg6[%c1_84, %c0_85, %c0_86] : memref<3x64x64xbf16, #tpu.memory_space<vmem>>, vector<1x64x64xbf16>
    %84 = vector.shape_cast %83 : vector<1x64x64xbf16> to vector<64x64xbf16>
    %85 = vector.shape_cast %84 : vector<64x64xbf16> to vector<1x64x64xbf16>
    %86 = vector.broadcast %85 : vector<1x64x64xbf16> to vector<2x64x64xbf16>
    "tpu.trace_start"() <{level = 10 : i32, message = "bhk,bkn->bhn"}> : () -> ()
    %cst_87 = arith.constant dense<0.000000e+00> : vector<2x2x64xf32>
    %87 = tpu.matmul %82, %86, %cst_87 {dimension_numbers = #tpu.dot_dimension_numbers<[2], [1], [1], [2], [0, 0, 0, 1, 1, 2], [0], [0]>} : vector<2x2x64xbf16>, vector<2x64x64xbf16>, vector<2x2x64xf32> -> vector<2x2x64xf32>
    "tpu.trace_stop"() : () -> ()
    %88 = arith.addf %80, %87 : vector<2x2x64xf32>
    %c0_88 = arith.constant 0 : index
    %c2_89 = arith.constant 2 : index
    %c0_90 = arith.constant 0 : index
    %89 = tpu.strided_load %arg15[%c0_88, %c2_89, %c0_90] {strides = array<i32: 1, 2, 1>} : memref<2x5x64xf32, #tpu.memory_space<vmem>>, vector<2x2x64xf32>
    %90 = arith.truncf %89 : vector<2x2x64xf32> to vector<2x2x64xbf16>
    %c2_91 = arith.constant 2 : index
    %c0_92 = arith.constant 0 : index
    %c0_93 = arith.constant 0 : index
    %91 = vector.load %arg6[%c2_91, %c0_92, %c0_93] : memref<3x64x64xbf16, #tpu.memory_space<vmem>>, vector<1x64x64xbf16>
    %92 = vector.shape_cast %91 : vector<1x64x64xbf16> to vector<64x64xbf16>
    %93 = vector.shape_cast %92 : vector<64x64xbf16> to vector<1x64x64xbf16>
    %94 = vector.broadcast %93 : vector<1x64x64xbf16> to vector<2x64x64xbf16>
    "tpu.trace_start"() <{level = 10 : i32, message = "bhk,bkn->bhn"}> : () -> ()
    %cst_94 = arith.constant dense<0.000000e+00> : vector<2x2x64xf32>
    %95 = tpu.matmul %90, %94, %cst_94 {dimension_numbers = #tpu.dot_dimension_numbers<[2], [1], [1], [2], [0, 0, 0, 1, 1, 2], [0], [0]>} : vector<2x2x64xbf16>, vector<2x64x64xbf16>, vector<2x2x64xf32> -> vector<2x2x64xf32>
    "tpu.trace_stop"() : () -> ()
    %96 = arith.addf %88, %95 : vector<2x2x64xf32>
    %c0_95 = arith.constant 0 : index
    %c0_96 = arith.constant 0 : index
    %c0_97 = arith.constant 0 : index
    %97 = vector.load %arg7[%c0_95, %c0_96, %c0_97] : memref<1x1x64xf32, #tpu.memory_space<vmem>>, vector<1x1x64xf32>
    %98 = vector.broadcast %97 : vector<1x1x64xf32> to vector<2x2x64xf32>
    %99 = arith.addf %96, %98 : vector<2x2x64xf32>
    %cst_98 = arith.constant 0.000000e+00 : f32
    %100 = vector.broadcast %cst_98 : f32 to vector<2x2x64xf32>
    %101 = arith.maximumf %99, %100 : vector<2x2x64xf32>
    %cst_99 = arith.constant 0.000000e+00 : f32
    %102 = vector.broadcast %cst_99 : f32 to vector<2x1x64xf32>
    %c0_100 = arith.constant 0 : index
    %c0_101 = arith.constant 0 : index
    %c0_102 = arith.constant 0 : index
    %103 = vector.load %arg16[%c0_100, %c0_101, %c0_102] : memref<2x3x64xf32, #tpu.memory_space<vmem>>, vector<2x1x64xf32>
    tpu.vector_store %arg16[%c0_100, %c0_101, %c0_102], %102 {strides = array<i32>} : memref<2x3x64xf32, #tpu.memory_space<vmem>>, vector<2x1x64xf32>,
    %c0_103 = arith.constant 0 : index
    %c1_104 = arith.constant 1 : index
    %c0_105 = arith.constant 0 : index
    %104 = vector.load %arg16[%c0_103, %c1_104, %c0_105] : memref<2x3x64xf32, #tpu.memory_space<vmem>>, vector<2x2x64xf32>
    tpu.vector_store %arg16[%c0_103, %c1_104, %c0_105], %101 {strides = array<i32>} : memref<2x3x64xf32, #tpu.memory_space<vmem>>, vector<2x2x64xf32>,
    %cst_106 = arith.constant 0.000000e+00 : f32
    %105 = vector.broadcast %cst_106 : f32 to vector<2x1x64xf32>
    %c0_107 = arith.constant 0 : index
    %c1_108 = arith.constant 1 : index
    %c0_109 = arith.constant 0 : index
    %106 = tpu.strided_load %arg16[%c0_107, %c1_108, %c0_109] {strides = array<i32: 1, 2, 1>} : memref<2x3x64xf32, #tpu.memory_space<vmem>>, vector<2x1x64xf32>
    %107 = arith.truncf %106 : vector<2x1x64xf32> to vector<2x1x64xbf16>
    %c0_110 = arith.constant 0 : index
    %c0_111 = arith.constant 0 : index
    %c0_112 = arith.constant 0 : index
    %108 = vector.load %arg8[%c0_110, %c0_111, %c0_112] : memref<2x64x64xbf16, #tpu.memory_space<vmem>>, vector<1x64x64xbf16>
    %109 = vector.shape_cast %108 : vector<1x64x64xbf16> to vector<64x64xbf16>
    %110 = vector.shape_cast %109 : vector<64x64xbf16> to vector<1x64x64xbf16>
    %111 = vector.broadcast %110 : vector<1x64x64xbf16> to vector<2x64x64xbf16>
    "tpu.trace_start"() <{level = 10 : i32, message = "bhk,bkn->bhn"}> : () -> ()
    %cst_113 = arith.constant dense<0.000000e+00> : vector<2x1x64xf32>
    %112 = tpu.matmul %107, %111, %cst_113 {dimension_numbers = #tpu.dot_dimension_numbers<[2], [1], [1], [2], [0, 0, 0, 1, 1, 2], [0], [0]>} : vector<2x1x64xbf16>, vector<2x64x64xbf16>, vector<2x1x64xf32> -> vector<2x1x64xf32>
    "tpu.trace_stop"() : () -> ()
    %113 = arith.addf %105, %112 : vector<2x1x64xf32>
    %c0_114 = arith.constant 0 : index
    %c2_115 = arith.constant 2 : index
    %c0_116 = arith.constant 0 : index
    %114 = tpu.strided_load %arg16[%c0_114, %c2_115, %c0_116] {strides = array<i32: 1, 2, 1>} : memref<2x3x64xf32, #tpu.memory_space<vmem>>, vector<2x1x64xf32>
    %115 = arith.truncf %114 : vector<2x1x64xf32> to vector<2x1x64xbf16>
    %c1_117 = arith.constant 1 : index
    %c0_118 = arith.constant 0 : index
    %c0_119 = arith.constant 0 : index
    %116 = vector.load %arg8[%c1_117, %c0_118, %c0_119] : memref<2x64x64xbf16, #tpu.memory_space<vmem>>, vector<1x64x64xbf16>
    %117 = vector.shape_cast %116 : vector<1x64x64xbf16> to vector<64x64xbf16>
    %118 = vector.shape_cast %117 : vector<64x64xbf16> to vector<1x64x64xbf16>
    %119 = vector.broadcast %118 : vector<1x64x64xbf16> to vector<2x64x64xbf16>
    "tpu.trace_start"() <{level = 10 : i32, message = "bhk,bkn->bhn"}> : () -> ()
    %cst_120 = arith.constant dense<0.000000e+00> : vector<2x1x64xf32>
    %120 = tpu.matmul %115, %119, %cst_120 {dimension_numbers = #tpu.dot_dimension_numbers<[2], [1], [1], [2], [0, 0, 0, 1, 1, 2], [0], [0]>} : vector<2x1x64xbf16>, vector<2x64x64xbf16>, vector<2x1x64xf32> -> vector<2x1x64xf32>
    "tpu.trace_stop"() : () -> ()
    %121 = arith.addf %113, %120 : vector<2x1x64xf32>
    %c0_121 = arith.constant 0 : index
    %c0_122 = arith.constant 0 : index
    %c0_123 = arith.constant 0 : index
    %122 = vector.load %arg9[%c0_121, %c0_122, %c0_123] : memref<1x1x64xf32, #tpu.memory_space<vmem>>, vector<1x1x64xf32>
    %123 = vector.broadcast %122 : vector<1x1x64xf32> to vector<2x1x64xf32>
    %124 = arith.addf %121, %123 : vector<2x1x64xf32>
    %cst_124 = arith.constant 0.000000e+00 : f32
    %125 = vector.broadcast %cst_124 : f32 to vector<2x1x64xf32>
    %126 = arith.maximumf %124, %125 : vector<2x1x64xf32>
    %cst_125 = arith.constant 0.000000e+00 : f32
    %127 = vector.broadcast %cst_125 : f32 to vector<2x1x1xf32>
    %128 = arith.truncf %126 : vector<2x1x64xf32> to vector<2x1x64xbf16>
    %c0_126 = arith.constant 0 : index
    %c0_127 = arith.constant 0 : index
    %c0_128 = arith.constant 0 : index
    %129 = vector.load %arg10[%c0_126, %c0_127, %c0_128] : memref<1x64x1xbf16, #tpu.memory_space<vmem>>, vector<1x64x1xbf16>
    %130 = vector.shape_cast %129 : vector<1x64x1xbf16> to vector<64x1xbf16>
    %131 = vector.shape_cast %130 : vector<64x1xbf16> to vector<1x64x1xbf16>
    %132 = vector.broadcast %131 : vector<1x64x1xbf16> to vector<2x64x1xbf16>
    "tpu.trace_start"() <{level = 10 : i32, message = "bhk,bkn->bhn"}> : () -> ()
    %cst_129 = arith.constant dense<0.000000e+00> : vector<2x1x1xf32>
    %133 = tpu.matmul %128, %132, %cst_129 {dimension_numbers = #tpu.dot_dimension_numbers<[2], [1], [1], [2], [0, 0, 0, 1, 1, 2], [0], [0]>} : vector<2x1x64xbf16>, vector<2x64x1xbf16>, vector<2x1x1xf32> -> vector<2x1x1xf32>
    "tpu.trace_stop"() : () -> ()
    %134 = arith.addf %127, %133 : vector<2x1x1xf32>
    %c0_130 = arith.constant 0 : index
    %c0_131 = arith.constant 0 : index
    %c0_132 = arith.constant 0 : index
    %135 = vector.load %arg11[%c0_130, %c0_131, %c0_132] : memref<1x1x1xf32, #tpu.memory_space<vmem>>, vector<1x1x1xf32>
    %136 = vector.broadcast %135 : vector<1x1x1xf32> to vector<2x1x1xf32>
    %137 = arith.addf %134, %136 : vector<2x1x1xf32>
    %cst_133 = arith.constant 0.000000e+00 : f32
    %138 = vector.broadcast %cst_133 : f32 to vector<2x1x1xf32>
    %139 = arith.maximumf %137, %138 : vector<2x1x1xf32>
    %140 = vector.shape_cast %139 : vector<2x1x1xf32> to vector<1x2x1x1xf32>
    %cst_134 = arith.constant dense<0.000000e+00> : vector<1xf32>
    %141 = vector.multi_reduction <add>, %140, %cst_134 [1, 2, 3] : vector<1x2x1x1xf32> to vector<1xf32>
    %142 = vector.shape_cast %141 : vector<1xf32> to vector<1x1x1x1xf32>
    %143 = vector.extract %142[0, 0, 0, 0] : f32 from vector<1x1x1x1xf32>
    %144 = vector.broadcast %143 : f32 to vector<1x1x1xf32>
    %145 = vector.shape_cast %144 : vector<1x1x1xf32> to vector<1x1x1xf32>
    %146 = vector.broadcast %145 : vector<1x1x1xf32> to vector<1x1x128xf32>
    %c0_135 = arith.constant 0 : index
    %c0_136 = arith.constant 0 : index
    %c0_137 = arith.constant 0 : index
    %147 = vector.load %arg12[%c0_135, %c0_136, %c0_137] : memref<1x1x128xf32, #tpu.memory_space<vmem>>, vector<1x1x128xf32>
    tpu.vector_store %arg12[%c0_135, %c0_136, %c0_137], %146 {strides = array<i32>} : memref<1x1x128xf32, #tpu.memory_space<vmem>>, vector<1x1x128xf32>,
    return
  }
  func.func @transform_0(%arg0: i32) -> (i32, i32, i32) {
    %c0_i32 = arith.constant 0 : i32
    %c0_i32_0 = arith.constant 0 : i32
    %c0_i32_1 = arith.constant 0 : i32
    return %arg0, %c0_i32, %c0_i32_0 : i32, i32, i32
  }
  func.func @transform_1(%arg0: i32) -> (i32, i32, i32) {
    %c0_i32 = arith.constant 0 : i32
    %c0_i32_0 = arith.constant 0 : i32
    %c0_i32_1 = arith.constant 0 : i32
    %c0_i32_2 = arith.constant 0 : i32
    return %c0_i32, %c0_i32_0, %c0_i32_1 : i32, i32, i32
  }
  func.func @transform_2(%arg0: i32) -> (i32, i32, i32) {
    %c0_i32 = arith.constant 0 : i32
    %c0_i32_0 = arith.constant 0 : i32
    %c0_i32_1 = arith.constant 0 : i32
    %c0_i32_2 = arith.constant 0 : i32
    return %c0_i32, %c0_i32_0, %c0_i32_1 : i32, i32, i32
  }
  func.func @transform_3(%arg0: i32) -> (i32, i32, i32) {
    %c0_i32 = arith.constant 0 : i32
    %c0_i32_0 = arith.constant 0 : i32
    %c0_i32_1 = arith.constant 0 : i32
    %c0_i32_2 = arith.constant 0 : i32
    return %c0_i32, %c0_i32_0, %c0_i32_1 : i32, i32, i32
  }
  func.func @transform_4(%arg0: i32) -> (i32, i32, i32) {
    %c0_i32 = arith.constant 0 : i32
    %c0_i32_0 = arith.constant 0 : i32
    %c0_i32_1 = arith.constant 0 : i32
    %c0_i32_2 = arith.constant 0 : i32
    return %c0_i32, %c0_i32_0, %c0_i32_1 : i32, i32, i32
  }
  func.func @transform_5(%arg0: i32) -> (i32, i32, i32) {
    %c0_i32 = arith.constant 0 : i32
    %c0_i32_0 = arith.constant 0 : i32
    %c0_i32_1 = arith.constant 0 : i32
    %c0_i32_2 = arith.constant 0 : i32
    return %c0_i32, %c0_i32_0, %c0_i32_1 : i32, i32, i32
  }
  func.func @transform_6(%arg0: i32) -> (i32, i32, i32) {
    %c0_i32 = arith.constant 0 : i32
    %c0_i32_0 = arith.constant 0 : i32
    %c0_i32_1 = arith.constant 0 : i32
    %c0_i32_2 = arith.constant 0 : i32
    return %c0_i32, %c0_i32_0, %c0_i32_1 : i32, i32, i32
  }
  func.func @transform_7(%arg0: i32) -> (i32, i32, i32) {
    %c0_i32 = arith.constant 0 : i32
    %c0_i32_0 = arith.constant 0 : i32
    %c0_i32_1 = arith.constant 0 : i32
    %c0_i32_2 = arith.constant 0 : i32
    return %c0_i32, %c0_i32_0, %c0_i32_1 : i32, i32, i32
  }
  func.func @transform_8(%arg0: i32) -> (i32, i32, i32) {
    %c0_i32 = arith.constant 0 : i32
    %c0_i32_0 = arith.constant 0 : i32
    %c0_i32_1 = arith.constant 0 : i32
    %c0_i32_2 = arith.constant 0 : i32
    return %c0_i32, %c0_i32_0, %c0_i32_1 : i32, i32, i32
  }
  func.func @transform_9(%arg0: i32) -> (i32, i32, i32) {
    %c0_i32 = arith.constant 0 : i32
    %c0_i32_0 = arith.constant 0 : i32
    %c0_i32_1 = arith.constant 0 : i32
    %c0_i32_2 = arith.constant 0 : i32
    return %c0_i32, %c0_i32_0, %c0_i32_1 : i32, i32, i32
  }
  func.func @transform_10(%arg0: i32) -> (i32, i32, i32) {
    %c0_i32 = arith.constant 0 : i32
    %c0_i32_0 = arith.constant 0 : i32
    %c0_i32_1 = arith.constant 0 : i32
    %c0_i32_2 = arith.constant 0 : i32
    return %c0_i32, %c0_i32_0, %c0_i32_1 : i32, i32, i32
  }
  func.func @transform_11(%arg0: i32) -> (i32, i32, i32) {
    %c0_i32 = arith.constant 0 : i32
    %c0_i32_0 = arith.constant 0 : i32
    %c0_i32_1 = arith.constant 0 : i32
    return %arg0, %c0_i32, %c0_i32_0 : i32, i32, i32
  }
}

</mosaic_0001>

<bundles_post_ra>
// kernel: tpu_custom_call.1
= control target key start
LH: loop header
LB: loop body
LE: loop exit
PB: predicated region body
PF: predicated region fallthrough
CT: control target
= control target key end

     0   :  { %s2611_s0 = inlined_call_operand.vmem [shape: f32[2,16,48], index: 0, kind: input, shape index: {}]   ;;  %s2612_s1 = inlined_call_operand.hbm [shape: bf16[3,48,64], index: 1, kind: input, shape index: {}]   ;;  %s2613_s2 = inlined_call_operand.vmem [shape: f32[1,1,64], index: 2, kind: input, shape index: {}]   ;;  %s2614_s3 = inlined_call_operand.hbm [shape: bf16[3,64,64], index: 3, kind: input, shape index: {}]   ;;  %s2615_s4 = inlined_call_operand.vmem [shape: f32[1,1,64], index: 4, kind: input, shape index: {}]   ;;  %s2616_s5 = inlined_call_operand.hbm [shape: bf16[3,64,64], index: 5, kind: input, shape index: {}]   ;;  %s2617_s6 = inlined_call_operand.vmem [shape: f32[1,1,64], index: 6, kind: input, shape index: {}]   ;;  %s2618_s7 = inlined_call_operand.hbm [shape: bf16[2,64,64], index: 7, kind: input, shape index: {}]   ;;  %s2619_s8 = inlined_call_operand.vmem [shape: f32[1,1,64], index: 8, kind: input, shape index: {}]   ;;  %s2620_s9 = inlined_call_operand.vmem [shape: bf16[1,64,1], index: 9, kind: input, shape index: {}]   ;;  %s2621_s10 = inlined_call_operand.<no memory space> [shape: f32[1,1,1], index: 10, kind: input, shape index: {}]   ;;  %s2622_s11 = inlined_call_operand.hbm [shape: f32[1,1,128], index: 11, kind: output, shape index: {}]  }
   0x1   :  { %v16_v0 = vstv %s2621_s10 }
   0x2   :  { %17 = vst [vmem:[#allocation6] sm:$0x1] %v16_v0 }
   0x3   :  { %18 = vsyncpa [#allocation8], 0 }
   0x4   :  { %19 = vsyncpa [#allocation11], 0 }
   0x5   :  { %20 = vsyncpa [#allocation14], 0 }
   0x6   :  { %21 = vsyncpa [#allocation9], 0  ;;  %s2302_s19 = smov [#allocation10]   ;;  %s2303_s21 = smov [#allocation7]  }
   0x7   :  { %s43_s20 = sshll.u32 %s2302_s19, 4  ;;  %s29_s22 = sshll.u32 %s2303_s21, 4  ;;  %s44_s20 = int_to_ptr.vmem [resolvable:$true] %s43_s20  ;;  %s30_s22 = int_to_ptr.vmem [resolvable:$true] %s29_s22 }
   0x8   :  { %s2202_s23 = scalar_lea.vmem %s44_s20, 1536  ;;  %p2207_p1 = scmp.lt.s32.totalorder %s44_s20, %s44_s20 }
   0x9   :  { %p2203_p0 = scmp.ne.s32.totalorder %s44_s20, %s2202_s23  ;;  %p2208_p2 = scmp.lt.s32.totalorder %s2202_s23, %s2202_s23 }
   0xb   :  { %p2209_p3 = por %p2208_p2, %p2207_p1 }
   0xd   :  { %p2210_p4 = pnand %p2209_p3, %p2203_p0 }
   0xf   :  { %2213 = shalt.err (!%p2210_p4)
}
  0x10   :  { %s2304_s24 = smov 64   ;;  %s2305_s10 = smov 4  }
  0x11   :  { %49 = dma.hbm_to_vmem [thread:$0]  %s2614_s3, 1536, %s44_s20, [#allocation11], %s2304_s24, %s2304_s24, %s2305_s10  }
  0x12   :  { %s2222_s27 = scalar_lea.vmem %s30_s22, 1152  ;;  %p2227_p6 = scmp.lt.s32.totalorder %s30_s22, %s30_s22 }
  0x13   :  { %p2223_p5 = scmp.ne.s32.totalorder %s30_s22, %s2222_s27  ;;  %p2228_p7 = scmp.lt.s32.totalorder %s2222_s27, %s2222_s27 }
  0x15   :  { %p2229_p8 = por %p2228_p7, %p2227_p6 }
  0x17   :  { %p2230_p9 = pnand %p2229_p8, %p2223_p5 }
  0x19   :  { %2233 = shalt.err (!%p2230_p9)
}
  0x1a   :  { %35 = dma.hbm_to_vmem [thread:$0]  %s2612_s1, 1152, %s30_s22, [#allocation8], %s2304_s24, %s2304_s24, %s2305_s10  }
  0x1b   :  { %s2306_s30 = smov [#allocation12]   ;;  %s2307_s13 = smov [#allocation13]  }
  0x1c   :  { %s57_s12 = sshll.u32 %s2306_s30, 4  ;;  %s71_s14 = sshll.u32 %s2307_s13, 4  ;;  %s58_s12 = int_to_ptr.vmem [resolvable:$true] %s57_s12  ;;  %s72_s14 = int_to_ptr.vmem [resolvable:$true] %s71_s14 }
  0x1d   :  { %s2242_s3 = scalar_lea.vmem %s58_s12, 1536  ;;  %p2247_p11 = scmp.lt.s32.totalorder %s58_s12, %s58_s12 }
  0x1e   :  { %p2243_p10 = scmp.ne.s32.totalorder %s58_s12, %s2242_s3  ;;  %p2248_p12 = scmp.lt.s32.totalorder %s2242_s3, %s2242_s3 }
  0x20   :  { %p2249_p13 = por %p2248_p12, %p2247_p11 }
  0x22   :  { %p2250_p0 = pnand %p2249_p13, %p2243_p10 }
  0x24   :  { %2253 = shalt.err (!%p2250_p0)
}
  0x25   :  { %63 = dma.hbm_to_vmem [thread:$0]  %s2616_s5, 1536, %s58_s12, [#allocation11], %s2304_s24, %s2304_s24, %s2305_s10  }
  0x26   :  { %s2262_s1 = scalar_lea.vmem %s72_s14, 1024  ;;  %p2267_p2 = scmp.lt.s32.totalorder %s72_s14, %s72_s14 }
  0x27   :  { %p2263_p1 = scmp.ne.s32.totalorder %s72_s14, %s2262_s1  ;;  %p2268_p3 = scmp.lt.s32.totalorder %s2262_s1, %s2262_s1 }
  0x29   :  { %p2269_p4 = por %p2268_p3, %p2267_p2 }
  0x2b   :  { %p2270_p5 = pnand %p2269_p4, %p2263_p1 }
  0x2d   :  { %2273 = shalt.err (!%p2270_p5)
}
  0x2e   :  { %77 = dma.hbm_to_vmem [thread:$0]  %s2618_s7, 1024, %s72_s14, [#allocation14], %s2304_s24, %s2304_s24, %s2305_s10  }
  0x2f   :  { %2294 = dma.done.wait [#allocation8], 1152  }
  0x30   :  { %2295 = vsyncadd [#allocation8], 4294966144 }
  0x31   :  { %2296 = dma.done.wait [#allocation11], 3072  }
  0x32   :  { %2297 = vsyncadd [#allocation11], 4294964224 }
  0x33   :  { %2298 = dma.done.wait [#allocation14], 1024  }
  0x34   :  { %2299 = vsyncadd [#allocation14], 4294966272  ;;  %vm105_vm0 = vcmask 385024   ;;  %v2308_v1 = vmov 0.0   ;;  %vm2309_vm1 = vmmov 0   ;;  %v2149_v2 = vld [vmem:[#allocation7 + $0x28] sm:$0xff]  }
  0x35   :  { %1862 = vmatprep.subr.bf16.mxu0 %v2308_v1  ;;  %1872 = vmatprep.subr.bf16.mxu1 %v2308_v1  ;;  %106 = vst.msk [vmem:[#allocation2] sm:$0x1] %vm105_vm0, %v2308_v1  ;;  %107 = vst.msk [vmem:[#allocation2 + $0x18] sm:$0x1] %vm105_vm0, %v2308_v1  ;;  %v2150_v3 = vld [vmem:[#allocation7 + $0x20] sm:$0xff]   ;;  %v97_v4 = vld [vmem:[%s2611_s0] sm:$0xff] }
  0x36   :  { %1868 = vmatprep.mubr.msk.bf16.mxu0 %vm2309_vm1, %v2308_v1  ;;  %1878 = vmatprep.mubr.msk.bf16.mxu1 %vm2309_vm1, %v2308_v1  ;;  %v98_v5 = vld [vmem:[%s2611_s0 + $0x8] sm:$0xff]  ;;  %vm108_vm2 = vcmask 392192   ;;  %v99_v6 = vld [vmem:[%s2611_s0 + $0x10] sm:$0xff]  ;;  %v1672_v7 = vadd.f32 -0.5, %v97_v4  ;;  %v100_v9 = vld [vmem:[%s2611_s0 + $0x18] sm:$0xff]  ;;  %vm475_vm3 = vcmask 516096  }
  0x37   :  { %1863 = vmatpush3.bf16.msra.mxu0 %v2149_v2  ;;  %1873 = vmatpush3.bf16.msra.mxu1 %v2149_v2  ;;  %v1673_v8 = vadd.f32 -0.5, %v98_v5  ;;  %v1674_v10 = vadd.f32 -0.5, %v99_v6  ;;  %v1675_v11 = vadd.f32 -0.5, %v100_v9  ;;  %v2151_v12 = vld [vmem:[#allocation7 + $0x18] sm:$0xff]   ;;  %v2152_v14 = vld [vmem:[#allocation7 + $0x10] sm:$0xff]   ;;  %v2153_v18 = vld [vmem:[#allocation7 + $0x8] sm:$0xff]  }
  0x38   :  { %1864 = vmatprep.subr.bf16.mxu0 %v2308_v1  ;;  %1874 = vmatprep.subr.bf16.mxu1 %v2308_v1  ;;  %109 = vst.msk [vmem:[#allocation2 + $0x1] sm:$0xff] %vm108_vm2, %v1672_v7  ;;  %v2154_v19 = vld [vmem:[#allocation7] sm:$0xff]   ;;  %v2156_v25 = vld [vmem:[#allocation7 + $0x38] sm:$0xff]   ;;  %v2157_v26 = vld [vmem:[#allocation7 + $0x30] sm:$0xff]   ;;  %vm478_vm4 = vcmask 523264   ;;  %vm869_vm5 = vcmask 519168  }
  0x39   :  { %110 = vst.msk [vmem:[#allocation2 + $0x9] sm:$0xff] %vm108_vm2, %v1673_v8  ;;  %111 = vst.msk [vmem:[#allocation2 + $0x19] sm:$0xff] %vm108_vm2, %v1674_v10  ;;  %v2155_v22 = vld [vmem:[#allocation7 + $0x40] sm:$0xff]   ;;  %v2159_v32 = vld [vmem:[#allocation10 + $0x30] sm:$0xff]   ;;  %vm1260_vm6 = vcmask 517120   ;;  %vm1640_vm7 = vcmask 0  }
  0x3a   :  { %112 = vst.msk [vmem:[#allocation2 + $0x21] sm:$0xff] %vm108_vm2, %v1675_v11  ;;  %v2158_v31 = vld [vmem:[#allocation10 + $0x38] sm:$0xff]   ;;  %v2160_v33 = vld [vmem:[#allocation10 + $0x28] sm:$0xff]   ;;  %v2161_v34 = vld [vmem:[#allocation10 + $0x20] sm:$0xff]  }
  0x3b   :  { %1865 = vmatpush3.bf16.msra.mxu0 %v2150_v3  ;;  %1875 = vmatpush3.bf16.msra.mxu1 %v2150_v3  ;;  %476 = vst.msk [vmem:[#allocation3] sm:$0x1] %vm475_vm3, %v2308_v1  ;;  %477 = vst.msk [vmem:[#allocation3 + $0x10] sm:$0x1] %vm475_vm3, %v2308_v1  ;;  %v1691_v54 = vld [vmem:[%s2613_s2] ss:$0 sm:$0xff] }
  0x3c   :  { %1866 = vmatprep.subr.bf16.mxu0 %v2308_v1  ;;  %1876 = vmatprep.subr.bf16.mxu1 %v2308_v1  ;;  %867 = vst.msk [vmem:[#allocation4] sm:$0x1] %vm475_vm3, %v2308_v1  ;;  %868 = vst.msk [vmem:[#allocation4 + $0x8] sm:$0x1] %vm475_vm3, %v2308_v1  ;;  %v2162_v6 = vld [vmem:[#allocation10 + $0x18] sm:$0xff]   ;;  %v2163_v10 = vld [vmem:[#allocation10 + $0x10] sm:$0xff]  }
  0x3d   :  { %v2164_v11 = vld [vmem:[#allocation10 + $0x8] sm:$0xff]  }
  0x3f   :  { %1867 = vmatpush3.bf16.msra.mxu0 %v2151_v12  ;;  %1877 = vmatpush3.bf16.msra.mxu1 %v2151_v12  ;;  %v2165_v12 = vld [vmem:[#allocation10] sm:$0xff]  }
  0x40   :  { %1882 = vmatprep.subr.bf16.mxu0 %v2308_v1  ;;  %1892 = vmatprep.subr.bf16.mxu1 %v2308_v1  ;;  %v125_v13 = vld [vmem:[#allocation2 + $0x1] ss:$2 sm:$0xff]  ;;  %v113_v20 = vld [vmem:[#allocation2] ss:$2 sm:$0xff] }
  0x41   :  { %v128_v15 = vpack.c.bf16 %v125_v13, %v125_v13  ;;  %v127_v16 = vld [vmem:[#allocation2 + $0x19] ss:$2 sm:$0xff]  ;;  %v115_v21 = vld [vmem:[#allocation2 + $0x18] ss:$2 sm:$0xff]  ;;  %v116_v23 = vpack.c.bf16 %v113_v20, %v113_v20 }
  0x42   :  { %v129_v17 = vpack.c.bf16 %v127_v16, %v127_v16  ;;  %v117_v24 = vpack.c.bf16 %v115_v21, %v115_v21  ;;  %v346_v27 = vld [vmem:[#allocation2 + $0x2] ss:$2 sm:$0xff]  ;;  %v2169_v20 = vld [vmem:[#allocation10 + $0x40] sm:$0xff]  }
  0x43   :  { %1869 = vmatmul.mubr.msk.bf16.vlgmr.msra.gmra.mxu0 %vm108_vm2, %v128_v15  ;;  %v348_v28 = vld [vmem:[#allocation2 + $0x1a] ss:$2 sm:$0xff]  ;;  %v349_v29 = vpack.c.bf16 %v346_v27, %v346_v27  ;;  %v2166_v15 = vld [vmem:[#allocation10 + $0x58] sm:$0xff]  }
  0x44   :  { %1879 = vmatmul.mubr.msk.bf16.vlgmr.msra.gmra.mxu1 %vm108_vm2, %v129_v17  ;;  %1883 = vmatpush3.bf16.msra.mxu0 %v2152_v14  ;;  %v350_v30 = vpack.c.bf16 %v348_v28, %v348_v28  ;;  %v2172_v27 = vld [vmem:[#allocation12 + $0x28] sm:$0xff]   ;;  %v2173_v28 = vld [vmem:[#allocation12 + $0x20] sm:$0xff]  }
  0x45   :  { %1893 = vmatpush3.bf16.msra.mxu1 %v2152_v14  ;;  %1884 = vmatprep.subr.bf16.mxu0 %v2308_v1 }
  0x46   :  { %1894 = vmatprep.subr.bf16.mxu1 %v2308_v1  ;;  %1888 = vmatprep.mubr.msk.bf16.mxu0 %vm2309_vm1, %v2308_v1 }
  0x47   :  { %1898 = vmatprep.mubr.msk.bf16.mxu1 %vm2309_vm1, %v2308_v1 }
  0x48   :  { %1885 = vmatpush3.bf16.msra.mxu0 %v2153_v18 }
  0x49   :  { %1895 = vmatpush3.bf16.msra.mxu1 %v2153_v18  ;;  %1886 = vmatprep.subr.bf16.mxu0 %v2308_v1  ;;  %v2167_v18 = vld [vmem:[#allocation10 + $0x50] sm:$0xff]  }
  0x4a   :  { %1896 = vmatprep.subr.bf16.mxu1 %v2308_v1 }
  0x4c   :  { %1887 = vmatpush3.bf16.msra.mxu0 %v2154_v19 }
  0x4d   :  { %1897 = vmatpush3.bf16.msra.mxu1 %v2154_v19  ;;  %1902 = vmatprep.subr.bf16.mxu0 %v2308_v1  ;;  %v2168_v19 = vld [vmem:[#allocation10 + $0x48] sm:$0xff]  }
  0x4e   :  { %1912 = vmatprep.subr.bf16.mxu1 %v2308_v1 }
  0x4f   :  { %1889 = vmatmul.mubr.msk.bf16.vlgmr.msra.gmra.mxu0 %vm108_vm2, %v116_v23 }
  0x50   :  { %1899 = vmatmul.mubr.msk.bf16.vlgmr.msra.gmra.mxu1 %vm108_vm2, %v117_v24  ;;  %1903 = vmatpush3.bf16.msra.mxu0 %v2155_v22 }
  0x51   :  { %1913 = vmatpush3.bf16.msra.mxu1 %v2155_v22  ;;  %1904 = vmatprep.subr.bf16.mxu0 %v2308_v1 }
  0x52   :  { %1914 = vmatprep.subr.bf16.mxu1 %v2308_v1  ;;  %1908 = vmatprep.mubr.msk.bf16.mxu0 %vm2309_vm1, %v2308_v1 }
  0x53   :  { %1918 = vmatprep.mubr.msk.bf16.mxu1 %vm2309_vm1, %v2308_v1 }
  0x54   :  { %1905 = vmatpush3.bf16.msra.mxu0 %v2156_v25 }
  0x55   :  { %1915 = vmatpush3.bf16.msra.mxu1 %v2156_v25  ;;  %1906 = vmatprep.subr.bf16.mxu0 %v2308_v1  ;;  %v2170_v25 = vld [vmem:[#allocation12 + $0x38] sm:$0xff]  }
  0x56   :  { %1916 = vmatprep.subr.bf16.mxu1 %v2308_v1 }
  0x58   :  { %1907 = vmatpush3.bf16.msra.mxu0 %v2157_v26 }
  0x59   :  { %1917 = vmatpush3.bf16.msra.mxu1 %v2157_v26  ;;  %1922 = vmatprep.subr.bf16.mxu0 %v2308_v1  ;;  %v2171_v26 = vld [vmem:[#allocation12 + $0x30] sm:$0xff]  }
  0x5a   :  { %1934 = vmatprep.subr.bf16.mxu1 %v2308_v1 }
  0x5b   :  { %1909 = vmatmul.mubr.msk.bf16.vlgmr.msra.gmra.mxu0 %vm108_vm2, %v349_v29 }
  0x5c   :  { %1919 = vmatmul.mubr.msk.bf16.vlgmr.msra.gmra.mxu1 %vm108_vm2, %v350_v30  ;;  %1930 = vmatprep.mubr.msk.bf16.mxu0 %vm2309_vm1, %v2308_v1 }
  0x5d   :  { %1942 = vmatprep.mubr.msk.bf16.mxu1 %vm2309_vm1, %v2308_v1  ;;  %1923 = vmatpush3.bf16.msra.mxu0 %v2158_v31 }
  0x5e   :  { %1935 = vmatpush3.bf16.msra.mxu1 %v2158_v31  ;;  %1924 = vmatprep.subr.bf16.mxu0 %v2308_v1 }
  0x5f   :  { %1936 = vmatprep.subr.bf16.mxu1 %v2308_v1 }
  0x61   :  { %1925 = vmatpush3.bf16.msra.mxu0 %v2159_v32 }
  0x62   :  { %1937 = vmatpush3.bf16.msra.mxu1 %v2159_v32  ;;  %1926 = vmatprep.subr.bf16.mxu0 %v2308_v1 }
  0x63   :  { %1938 = vmatprep.subr.bf16.mxu1 %v2308_v1 }
  0x65   :  { %1927 = vmatpush3.bf16.msra.mxu0 %v2160_v33 }
  0x66   :  { %1939 = vmatpush3.bf16.msra.mxu1 %v2160_v33  ;;  %1928 = vmatprep.subr.bf16.mxu0 %v2308_v1 }
  0x67   :  { %1940 = vmatprep.subr.bf16.mxu1 %v2308_v1 }
  0x69   :  { %1929 = vmatpush3.bf16.msra.mxu0 %v2161_v34 }
  0x6a   :  { %1941 = vmatpush3.bf16.msra.mxu1 %v2161_v34  ;;  %1946 = vmatprep.subr.bf16.mxu0 %v2308_v1 }
  0x6b   :  { %1958 = vmatprep.subr.bf16.mxu1 %v2308_v1 }
 0x103   :  { %v192_v35 = vpop.f32.mrf.mxu0 }
 0x104   :  { %v235_v36 = vpop.f32.mrf.mxu1 }
 0x105   :  { %v1870_v37 = vpop.f32.mrf.mxu0 }
 0x106   :  { %v1880_v38 = vpop.f32.mrf.mxu1 }
 0x107   :  { %v195_v39 = vpop.f32.mrf.mxu0 }
 0x108   :  { %v238_v40 = vpop.f32.mrf.mxu1 }
 0x109   :  { %v1871_v41 = vpop.f32.mrf.mxu0 }
 0x10a   :  { %v1881_v42 = vpop.f32.mrf.mxu1 }
 0x10f   :  { %v296_v43 = vpop.f32.mrf.mxu0 }
 0x110   :  { %v339_v44 = vpop.f32.mrf.mxu1  ;;  %v297_v51 = vadd.f32 %v296_v43, %v192_v35 }
 0x111   :  { %v1890_v45 = vpop.f32.mrf.mxu0  ;;  %v340_v52 = vadd.f32 %v339_v44, %v235_v36 }
 0x112   :  { %v1900_v46 = vpop.f32.mrf.mxu1 }
 0x113   :  { %v299_v47 = vpop.f32.mrf.mxu0 }
 0x114   :  { %v342_v48 = vpop.f32.mrf.mxu1 }
 0x115   :  { %v1891_v49 = vpop.f32.mrf.mxu0  ;;  %v1710_v48 = vld [vmem:[%s2615_s4] ss:$0 sm:$0xff] }
 0x116   :  { %v1901_v50 = vpop.f32.mrf.mxu1 }
 0x11b   :  { %v413_v53 = vpop.f32.mrf.mxu0 }
 0x11c   :  { %v462_v55 = vadd.f32 %v413_v53, %v297_v51  ;;  %v456_v56 = vpop.f32.mrf.mxu1 }
 0x11d   :  { %v463_v57 = vadd.f32 %v456_v56, %v340_v52  ;;  %v1910_v58 = vpop.f32.mrf.mxu0 }
 0x11e   :  { %v471_v59 = vadd.f32 %v1691_v54, %v462_v55  ;;  %v1920_v60 = vpop.f32.mrf.mxu1 }
 0x11f   :  { %v472_v61 = vadd.f32 %v1691_v54, %v463_v57  ;;  %v416_v62 = vpop.f32.mrf.mxu0 }
 0x120   :  { %v473_v63 = vmax.f32 %v471_v59, 0.0  ;;  %v459_v0 = vpop.f32.mrf.mxu1 }
 0x121   :  { %v474_v2 = vmax.f32 %v472_v61, 0.0  ;;  %v1911_v3 = vpop.f32.mrf.mxu0 }
 0x122   :  { %479 = vst.msk [vmem:[#allocation3 + $0x1] sm:$0xff] %vm478_vm4, %v473_v63  ;;  %v1921_v4 = vpop.f32.mrf.mxu1  ;;  %v2174_v63 = vld [vmem:[#allocation12 + $0x18] sm:$0xff]  }
 0x123   :  { %480 = vst.msk [vmem:[#allocation3 + $0x11] sm:$0xff] %vm478_vm4, %v474_v2  ;;  %v2175_v4 = vld [vmem:[#allocation12 + $0x10] sm:$0xff]  }
 0x129   :  { %v495_v5 = vld [vmem:[#allocation3 + $0x1] ss:$2 sm:$0xf]  ;;  %v481_v13 = vld [vmem:[#allocation3] ss:$2 sm:$0xf] }
 0x12a   :  { %v498_v7 = vpack.c.bf16 %v495_v5, %v495_v5  ;;  %v497_v8 = vld [vmem:[#allocation3 + $0x11] ss:$2 sm:$0xf]  ;;  %v483_v14 = vld [vmem:[#allocation3 + $0x10] ss:$2 sm:$0xf]  ;;  %v484_v16 = vpack.c.bf16 %v481_v13, %v481_v13 }
 0x12b   :  { %v499_v9 = vpack.c.bf16 %v497_v8, %v497_v8  ;;  %v485_v17 = vpack.c.bf16 %v483_v14, %v483_v14  ;;  %v730_v21 = vld [vmem:[#allocation3 + $0x2] ss:$2 sm:$0xf]  ;;  %v732_v22 = vld [vmem:[#allocation3 + $0x12] ss:$2 sm:$0xf] }
 0x12c   :  { %1931 = vmatmul.mubr.msk.bf16.vlgmr.msra.gmra.mxu0 %vm478_vm4, %v498_v7  ;;  %v733_v23 = vpack.c.bf16 %v730_v21, %v730_v21  ;;  %v734_v24 = vpack.c.bf16 %v732_v22, %v732_v22  ;;  %v2176_v5 = vld [vmem:[#allocation12 + $0x8] sm:$0xff]   ;;  %v2181_v14 = vld [vmem:[#allocation12 + $0x40] sm:$0xff]  }
 0x12d   :  { %1943 = vmatmul.mubr.msk.bf16.vlgmr.msra.gmra.mxu1 %vm478_vm4, %v499_v9  ;;  %1947 = vmatpush3.bf16.msra.mxu0 %v2162_v6  ;;  %v2178_v9 = vld [vmem:[#allocation12 + $0x58] sm:$0xff]   ;;  %v2180_v13 = vld [vmem:[#allocation12 + $0x48] sm:$0xff]   ;;  %v2185_v22 = vld [vmem:[#allocation13 + $0x20] sm:$0xff]  }
 0x12e   :  { %1959 = vmatpush3.bf16.msra.mxu1 %v2162_v6  ;;  %1948 = vmatprep.subr.bf16.mxu0 %v2308_v1  ;;  %v2177_v6 = vld [vmem:[#allocation12] sm:$0xff]   ;;  %v2184_v21 = vld [vmem:[#allocation13 + $0x28] sm:$0xff]  }
 0x12f   :  { %1960 = vmatprep.subr.bf16.mxu1 %v2308_v1  ;;  %1954 = vmatprep.mubr.msk.bf16.mxu0 %vm2309_vm1, %v2308_v1 }
 0x130   :  { %1966 = vmatprep.mubr.msk.bf16.mxu1 %vm2309_vm1, %v2308_v1 }
 0x131   :  { %1949 = vmatpush3.bf16.msra.mxu0 %v2163_v10 }
 0x132   :  { %1961 = vmatpush3.bf16.msra.mxu1 %v2163_v10  ;;  %1950 = vmatprep.subr.bf16.mxu0 %v2308_v1 }
 0x133   :  { %1962 = vmatprep.subr.bf16.mxu1 %v2308_v1 }
 0x135   :  { %1951 = vmatpush3.bf16.msra.mxu0 %v2164_v11 }
 0x136   :  { %1963 = vmatpush3.bf16.msra.mxu1 %v2164_v11  ;;  %1952 = vmatprep.subr.bf16.mxu0 %v2308_v1 }
 0x137   :  { %1964 = vmatprep.subr.bf16.mxu1 %v2308_v1 }
 0x139   :  { %1953 = vmatpush3.bf16.msra.mxu0 %v2165_v12 }
 0x13a   :  { %1965 = vmatpush3.bf16.msra.mxu1 %v2165_v12  ;;  %1970 = vmatprep.subr.bf16.mxu0 %v2308_v1  ;;  %v2179_v12 = vld [vmem:[#allocation12 + $0x50] sm:$0xff]  }
 0x13b   :  { %1982 = vmatprep.subr.bf16.mxu1 %v2308_v1 }
 0x13c   :  { %1955 = vmatmul.mubr.msk.bf16.vlgmr.msra.gmra.mxu0 %vm478_vm4, %v484_v16 }
 0x13d   :  { %1967 = vmatmul.mubr.msk.bf16.vlgmr.msra.gmra.mxu1 %vm478_vm4, %v485_v17  ;;  %1971 = vmatpush3.bf16.msra.mxu0 %v2166_v15 }
 0x13e   :  { %1983 = vmatpush3.bf16.msra.mxu1 %v2166_v15  ;;  %1972 = vmatprep.subr.bf16.mxu0 %v2308_v1 }
 0x13f   :  { %1984 = vmatprep.subr.bf16.mxu1 %v2308_v1  ;;  %1978 = vmatprep.mubr.msk.bf16.mxu0 %vm2309_vm1, %v2308_v1 }
 0x140   :  { %1990 = vmatprep.mubr.msk.bf16.mxu1 %vm2309_vm1, %v2308_v1 }
 0x141   :  { %1973 = vmatpush3.bf16.msra.mxu0 %v2167_v18 }
 0x142   :  { %1985 = vmatpush3.bf16.msra.mxu1 %v2167_v18  ;;  %1974 = vmatprep.subr.bf16.mxu0 %v2308_v1 }
 0x143   :  { %1986 = vmatprep.subr.bf16.mxu1 %v2308_v1 }
 0x145   :  { %1975 = vmatpush3.bf16.msra.mxu0 %v2168_v19 }
 0x146   :  { %1987 = vmatpush3.bf16.msra.mxu1 %v2168_v19  ;;  %1976 = vmatprep.subr.bf16.mxu0 %v2308_v1  ;;  %v2182_v19 = vld [vmem:[#allocation13 + $0x38] sm:$0xff]  }
 0x147   :  { %1988 = vmatprep.subr.bf16.mxu1 %v2308_v1 }
 0x149   :  { %1977 = vmatpush3.bf16.msra.mxu0 %v2169_v20 }
 0x14a   :  { %1989 = vmatpush3.bf16.msra.mxu1 %v2169_v20  ;;  %1994 = vmatprep.subr.bf16.mxu0 %v2308_v1  ;;  %v2183_v20 = vld [vmem:[#allocation13 + $0x30] sm:$0xff]  }
 0x14b   :  { %2006 = vmatprep.subr.bf16.mxu1 %v2308_v1 }
 0x14c   :  { %1979 = vmatmul.mubr.msk.bf16.vlgmr.msra.gmra.mxu0 %vm478_vm4, %v733_v23 }
 0x14d   :  { %1991 = vmatmul.mubr.msk.bf16.vlgmr.msra.gmra.mxu1 %vm478_vm4, %v734_v24  ;;  %2002 = vmatprep.mubr.msk.bf16.mxu0 %vm2309_vm1, %v2308_v1 }
 0x14e   :  { %2014 = vmatprep.mubr.msk.bf16.mxu1 %vm2309_vm1, %v2308_v1  ;;  %1995 = vmatpush3.bf16.msra.mxu0 %v2170_v25 }
 0x14f   :  { %2007 = vmatpush3.bf16.msra.mxu1 %v2170_v25  ;;  %1996 = vmatprep.subr.bf16.mxu0 %v2308_v1 }
 0x150   :  { %2008 = vmatprep.subr.bf16.mxu1 %v2308_v1 }
 0x152   :  { %1997 = vmatpush3.bf16.msra.mxu0 %v2171_v26 }
 0x153   :  { %2009 = vmatpush3.bf16.msra.mxu1 %v2171_v26  ;;  %1998 = vmatprep.subr.bf16.mxu0 %v2308_v1 }
 0x154   :  { %2010 = vmatprep.subr.bf16.mxu1 %v2308_v1 }
 0x156   :  { %1999 = vmatpush3.bf16.msra.mxu0 %v2172_v27 }
 0x157   :  { %2011 = vmatpush3.bf16.msra.mxu1 %v2172_v27  ;;  %2000 = vmatprep.subr.bf16.mxu0 %v2308_v1 }
 0x158   :  { %2012 = vmatprep.subr.bf16.mxu1 %v2308_v1 }
 0x15a   :  { %2001 = vmatpush3.bf16.msra.mxu0 %v2173_v28 }
 0x15b   :  { %2013 = vmatpush3.bf16.msra.mxu1 %v2173_v28  ;;  %2018 = vmatprep.subr.bf16.mxu0 %v2308_v1 }
 0x15c   :  { %2030 = vmatprep.subr.bf16.mxu1 %v2308_v1 }
 0x1ec   :  { %v570_v29 = vpop.f32.mrf.mxu0 }
 0x1ed   :  { %v613_v30 = vpop.f32.mrf.mxu1 }
 0x1ee   :  { %v1932_v31 = vpop.f32.mrf.mxu0 }
 0x1ef   :  { %v1944_v32 = vpop.f32.mrf.mxu1 }
 0x1f0   :  { %v573_v33 = vpop.f32.mrf.mxu0 }
 0x1f1   :  { %v616_v34 = vpop.f32.mrf.mxu1 }
 0x1f2   :  { %v1933_v35 = vpop.f32.mrf.mxu0 }
 0x1f3   :  { %v1945_v36 = vpop.f32.mrf.mxu1 }
 0x1fc   :  { %v680_v37 = vpop.f32.mrf.mxu0 }
 0x1fd   :  { %v723_v38 = vpop.f32.mrf.mxu1  ;;  %v681_v45 = vadd.f32 %v680_v37, %v570_v29 }
 0x1fe   :  { %v1956_v39 = vpop.f32.mrf.mxu0  ;;  %v724_v46 = vadd.f32 %v723_v38, %v613_v30 }
 0x1ff   :  { %v1968_v40 = vpop.f32.mrf.mxu1 }
 0x200   :  { %v683_v41 = vpop.f32.mrf.mxu0 }
 0x201   :  { %v726_v42 = vpop.f32.mrf.mxu1 }
 0x202   :  { %v1957_v43 = vpop.f32.mrf.mxu0  ;;  %v1729_v42 = vld [vmem:[%s2617_s6] ss:$0 sm:$0xff] }
 0x203   :  { %v1969_v44 = vpop.f32.mrf.mxu1 }
 0x20c   :  { %v805_v47 = vpop.f32.mrf.mxu0 }
 0x20d   :  { %v854_v49 = vadd.f32 %v805_v47, %v681_v45  ;;  %v848_v50 = vpop.f32.mrf.mxu1 }
 0x20e   :  { %v855_v51 = vadd.f32 %v848_v50, %v724_v46  ;;  %v1980_v52 = vpop.f32.mrf.mxu0 }
 0x20f   :  { %v863_v53 = vadd.f32 %v1710_v48, %v854_v49  ;;  %v1992_v54 = vpop.f32.mrf.mxu1 }
 0x210   :  { %v864_v55 = vadd.f32 %v1710_v48, %v855_v51  ;;  %v808_v56 = vpop.f32.mrf.mxu0 }
 0x211   :  { %v865_v57 = vmax.f32 %v863_v53, 0.0  ;;  %v851_v58 = vpop.f32.mrf.mxu1 }
 0x212   :  { %v866_v59 = vmax.f32 %v864_v55, 0.0  ;;  %v1981_v60 = vpop.f32.mrf.mxu0 }
 0x213   :  { %870 = vst.msk [vmem:[#allocation4 + $0x1] sm:$0xf] %vm869_vm5, %v865_v57  ;;  %v1993_v61 = vpop.f32.mrf.mxu1  ;;  %v2186_v57 = vld [vmem:[#allocation13 + $0x18] sm:$0xff]  }
 0x214   :  { %871 = vst.msk [vmem:[#allocation4 + $0x9] sm:$0xf] %vm869_vm5, %v866_v59  ;;  %v2187_v61 = vld [vmem:[#allocation13 + $0x10] sm:$0xff]  }
 0x21a   :  { %v886_v62 = vld [vmem:[#allocation4 + $0x1] ss:$2 sm:$0x3]  ;;  %v872_v7 = vld [vmem:[#allocation4] ss:$2 sm:$0x3] }
 0x21b   :  { %v889_v0 = vpack.c.bf16 %v886_v62, %v886_v62  ;;  %v888_v2 = vld [vmem:[#allocation4 + $0x9] ss:$2 sm:$0x3]  ;;  %v874_v8 = vld [vmem:[#allocation4 + $0x8] ss:$2 sm:$0x3]  ;;  %v875_v10 = vpack.c.bf16 %v872_v7, %v872_v7 }
 0x21c   :  { %v890_v3 = vpack.c.bf16 %v888_v2, %v888_v2  ;;  %v876_v11 = vpack.c.bf16 %v874_v8, %v874_v8  ;;  %v1121_v15 = vld [vmem:[#allocation4 + $0x2] ss:$2 sm:$0x3]  ;;  %v1123_v16 = vld [vmem:[#allocation4 + $0xa] ss:$2 sm:$0x3] }
 0x21d   :  { %2003 = vmatmul.mubr.msk.bf16.vlgmr.msra.gmra.mxu0 %vm478_vm4, %v889_v0  ;;  %v1124_v17 = vpack.c.bf16 %v1121_v15, %v1121_v15  ;;  %v1125_v18 = vpack.c.bf16 %v1123_v16, %v1123_v16  ;;  %v2188_v62 = vld [vmem:[#allocation13 + $0x8] sm:$0xff]   ;;  %v2192_v7 = vld [vmem:[%s2620_s9 + $0x8] sm:$0xff]  }
 0x21e   :  { %2015 = vmatmul.mubr.msk.bf16.vlgmr.msra.gmra.mxu1 %vm478_vm4, %v890_v3  ;;  %2019 = vmatpush3.bf16.msra.mxu0 %v2174_v63  ;;  %v2193_v8 = vld [vmem:[%s2620_s9] sm:$0xff]  }
 0x21f   :  { %2031 = vmatpush3.bf16.msra.mxu1 %v2174_v63  ;;  %2020 = vmatprep.subr.bf16.mxu0 %v2308_v1  ;;  %v2189_v63 = vld [vmem:[#allocation13] sm:$0xff]  }
 0x220   :  { %2032 = vmatprep.subr.bf16.mxu1 %v2308_v1  ;;  %2026 = vmatprep.mubr.msk.bf16.mxu0 %vm2309_vm1, %v2308_v1 }
 0x221   :  { %2038 = vmatprep.mubr.msk.bf16.mxu1 %vm2309_vm1, %v2308_v1 }
 0x222   :  { %2021 = vmatpush3.bf16.msra.mxu0 %v2175_v4 }
 0x223   :  { %2033 = vmatpush3.bf16.msra.mxu1 %v2175_v4  ;;  %2022 = vmatprep.subr.bf16.mxu0 %v2308_v1 }
 0x224   :  { %2034 = vmatprep.subr.bf16.mxu1 %v2308_v1 }
 0x226   :  { %2023 = vmatpush3.bf16.msra.mxu0 %v2176_v5 }
 0x227   :  { %2035 = vmatpush3.bf16.msra.mxu1 %v2176_v5  ;;  %2024 = vmatprep.subr.bf16.mxu0 %v2308_v1  ;;  %v2190_v5 = vld [vmem:[%s2620_s9 + $0x18] sm:$0xff]  }
 0x228   :  { %2036 = vmatprep.subr.bf16.mxu1 %v2308_v1 }
 0x22a   :  { %2025 = vmatpush3.bf16.msra.mxu0 %v2177_v6 }
 0x22b   :  { %2037 = vmatpush3.bf16.msra.mxu1 %v2177_v6  ;;  %2042 = vmatprep.subr.bf16.mxu0 %v2308_v1  ;;  %v2191_v6 = vld [vmem:[%s2620_s9 + $0x10] sm:$0xff]  }
 0x22c   :  { %2054 = vmatprep.subr.bf16.mxu1 %v2308_v1 }
 0x22d   :  { %2027 = vmatmul.mubr.msk.bf16.vlgmr.msra.gmra.mxu0 %vm478_vm4, %v875_v10 }
 0x22e   :  { %2039 = vmatmul.mubr.msk.bf16.vlgmr.msra.gmra.mxu1 %vm478_vm4, %v876_v11  ;;  %2043 = vmatpush3.bf16.msra.mxu0 %v2178_v9 }
 0x22f   :  { %2055 = vmatpush3.bf16.msra.mxu1 %v2178_v9  ;;  %2044 = vmatprep.subr.bf16.mxu0 %v2308_v1 }
 0x230   :  { %2056 = vmatprep.subr.bf16.mxu1 %v2308_v1  ;;  %2050 = vmatprep.mubr.msk.bf16.mxu0 %vm2309_vm1, %v2308_v1 }
 0x231   :  { %2062 = vmatprep.mubr.msk.bf16.mxu1 %vm2309_vm1, %v2308_v1 }
 0x232   :  { %2045 = vmatpush3.bf16.msra.mxu0 %v2179_v12 }
 0x233   :  { %2057 = vmatpush3.bf16.msra.mxu1 %v2179_v12  ;;  %2046 = vmatprep.subr.bf16.mxu0 %v2308_v1 }
 0x234   :  { %2058 = vmatprep.subr.bf16.mxu1 %v2308_v1 }
 0x236   :  { %2047 = vmatpush3.bf16.msra.mxu0 %v2180_v13 }
 0x237   :  { %2059 = vmatpush3.bf16.msra.mxu1 %v2180_v13  ;;  %2048 = vmatprep.subr.bf16.mxu0 %v2308_v1 }
 0x238   :  { %2060 = vmatprep.subr.bf16.mxu1 %v2308_v1 }
 0x23a   :  { %2049 = vmatpush3.bf16.msra.mxu0 %v2181_v14 }
 0x23b   :  { %2061 = vmatpush3.bf16.msra.mxu1 %v2181_v14  ;;  %2066 = vmatprep.subr.bf16.mxu0 %v2308_v1 }
 0x23c   :  { %2078 = vmatprep.subr.bf16.mxu1 %v2308_v1 }
 0x23d   :  { %2051 = vmatmul.mubr.msk.bf16.vlgmr.msra.gmra.mxu0 %vm478_vm4, %v1124_v17 }
 0x23e   :  { %2063 = vmatmul.mubr.msk.bf16.vlgmr.msra.gmra.mxu1 %vm478_vm4, %v1125_v18  ;;  %2074 = vmatprep.mubr.msk.bf16.mxu0 %vm2309_vm1, %v2308_v1  ;;  %v1512_v18 = vld [vmem:[%s2619_s8] sm:$0x1]  ;;  %s2310_s8 = smov [#allocation15]  }
 0x23f   :  { %2086 = vmatprep.mubr.msk.bf16.mxu1 %vm2309_vm1, %v2308_v1  ;;  %2067 = vmatpush3.bf16.msra.mxu0 %v2182_v19  ;;  %s1661_s9 = sshll.u32 %s2310_s8, 4  ;;  %s1662_s9 = int_to_ptr.vmem [resolvable:$true] %s1661_s9 }
 0x240   :  { %2079 = vmatpush3.bf16.msra.mxu1 %v2182_v19  ;;  %2068 = vmatprep.subr.bf16.mxu0 %v2308_v1  ;;  %s2274_s1 = scalar_lea.vmem %s1662_s9, 16  ;;  %s2278_s17 = scalar_lea.vmem %s1662_s9, 32 }
 0x241   :  { %2080 = vmatprep.subr.bf16.mxu1 %v2308_v1  ;;  %p2275_p6 = scmp.ne.s32.totalorder %s1662_s9, %s2274_s1  ;;  %p2279_p7 = scmp.lt.s32.totalorder %s1662_s9, %s1662_s9 }
 0x242   :  { %p2280_p8 = scmp.lt.s32.totalorder %s2278_s17, %s2274_s1 }
 0x243   :  { %2069 = vmatpush3.bf16.msra.mxu0 %v2183_v20 }
 0x244   :  { %2081 = vmatpush3.bf16.msra.mxu1 %v2183_v20  ;;  %2070 = vmatprep.subr.bf16.mxu0 %v2308_v1  ;;  %p2281_p9 = por %p2280_p8, %p2279_p7 }
 0x245   :  { %2082 = vmatprep.subr.bf16.mxu1 %v2308_v1 }
 0x246   :  { %p2282_p10 = pnand %p2281_p9, %p2275_p6 }
 0x247   :  { %2071 = vmatpush3.bf16.msra.mxu0 %v2184_v21 }
 0x248   :  { %2083 = vmatpush3.bf16.msra.mxu1 %v2184_v21  ;;  %2072 = vmatprep.subr.bf16.mxu0 %v2308_v1 }
 0x249   :  { %2084 = vmatprep.subr.bf16.mxu1 %v2308_v1 }
 0x24b   :  { %2073 = vmatpush3.bf16.msra.mxu0 %v2185_v22 }
 0x24c   :  { %2085 = vmatpush3.bf16.msra.mxu1 %v2185_v22  ;;  %2090 = vmatprep.subr.bf16.mxu0 %v2308_v1 }
 0x24d   :  { %2102 = vmatprep.subr.bf16.mxu1 %v2308_v1 }
 0x2dd   :  { %v961_v23 = vpop.f32.mrf.mxu0 }
 0x2de   :  { %v1004_v24 = vpop.f32.mrf.mxu1 }
 0x2df   :  { %v2004_v25 = vpop.f32.mrf.mxu0 }
 0x2e0   :  { %v2016_v26 = vpop.f32.mrf.mxu1 }
 0x2e1   :  { %v964_v27 = vpop.f32.mrf.mxu0 }
 0x2e2   :  { %v1007_v28 = vpop.f32.mrf.mxu1 }
 0x2e3   :  { %v2005_v29 = vpop.f32.mrf.mxu0 }
 0x2e4   :  { %v2017_v30 = vpop.f32.mrf.mxu1 }
 0x2ed   :  { %v1071_v31 = vpop.f32.mrf.mxu0 }
 0x2ee   :  { %v1114_v32 = vpop.f32.mrf.mxu1  ;;  %v1072_v39 = vadd.f32 %v1071_v31, %v961_v23 }
 0x2ef   :  { %v2028_v33 = vpop.f32.mrf.mxu0  ;;  %v1115_v40 = vadd.f32 %v1114_v32, %v1004_v24 }
 0x2f0   :  { %v2040_v34 = vpop.f32.mrf.mxu1  ;;  %v1527_v33 = vld [vmem:[#allocation6] sm:$0x1] }
 0x2f1   :  { %v1074_v35 = vpop.f32.mrf.mxu0 }
 0x2f2   :  { %v1117_v36 = vpop.f32.mrf.mxu1 }
 0x2f3   :  { %v2029_v37 = vpop.f32.mrf.mxu0 }
 0x2f4   :  { %v2041_v38 = vpop.f32.mrf.mxu1 }
 0x2fd   :  { %v1196_v41 = vpop.f32.mrf.mxu0 }
 0x2fe   :  { %v1245_v43 = vadd.f32 %v1196_v41, %v1072_v39  ;;  %v1239_v44 = vpop.f32.mrf.mxu1 }
 0x2ff   :  { %v1246_v45 = vadd.f32 %v1239_v44, %v1115_v40  ;;  %v2052_v46 = vpop.f32.mrf.mxu0 }
 0x300   :  { %v1254_v47 = vadd.f32 %v1729_v42, %v1245_v43  ;;  %v2064_v48 = vpop.f32.mrf.mxu1 }
 0x301   :  { %v1255_v49 = vadd.f32 %v1729_v42, %v1246_v45  ;;  %v1199_v50 = vpop.f32.mrf.mxu0 }
 0x302   :  { %v1256_v51 = vmax.f32 %v1254_v47, 0.0  ;;  %v1242_v52 = vpop.f32.mrf.mxu1 }
 0x303   :  { %v1257_v53 = vmax.f32 %v1255_v49, 0.0  ;;  %v2053_v54 = vpop.f32.mrf.mxu0 }
 0x304   :  { %1261 = vst.msk [vmem:[#allocation5 + $0x1] sm:$0x3] %vm1260_vm6, %v1256_v51  ;;  %v2065_v55 = vpop.f32.mrf.mxu1 }
 0x305   :  { %1262 = vst.msk [vmem:[#allocation5 + $0x5] sm:$0x3] %vm1260_vm6, %v1257_v53 }
 0x30b   :  { %v1278_v56 = vld [vmem:[#allocation5 + $0x2] ss:$2 sm:$0x1]  ;;  %v1264_v0 = vld [vmem:[#allocation5 + $0x1] ss:$2 sm:$0x1] }
 0x30c   :  { %v1281_v58 = vpack.c.bf16 %v1278_v56, %v1278_v56  ;;  %v1280_v59 = vld [vmem:[#allocation5 + $0x6] ss:$2 sm:$0x1]  ;;  %v1266_v2 = vld [vmem:[#allocation5 + $0x5] ss:$2 sm:$0x1]  ;;  %v1267_v3 = vpack.c.bf16 %v1264_v0, %v1264_v0 }
 0x30d   :  { %v1282_v60 = vpack.c.bf16 %v1280_v59, %v1280_v59  ;;  %v1268_v4 = vpack.c.bf16 %v1266_v2, %v1266_v2 }
 0x30e   :  { %2075 = vmatmul.mubr.msk.bf16.vlgmr.msra.gmra.mxu0 %vm478_vm4, %v1281_v58 }
 0x30f   :  { %2087 = vmatmul.mubr.msk.bf16.vlgmr.msra.gmra.mxu1 %vm478_vm4, %v1282_v60  ;;  %2091 = vmatpush3.bf16.msra.mxu0 %v2186_v57 }
 0x310   :  { %2103 = vmatpush3.bf16.msra.mxu1 %v2186_v57  ;;  %2092 = vmatprep.subr.bf16.mxu0 %v2308_v1 }
 0x311   :  { %2104 = vmatprep.subr.bf16.mxu1 %v2308_v1  ;;  %2098 = vmatprep.mubr.msk.bf16.mxu0 %vm2309_vm1, %v2308_v1 }
 0x312   :  { %2110 = vmatprep.mubr.msk.bf16.mxu1 %vm2309_vm1, %v2308_v1 }
 0x313   :  { %2093 = vmatpush3.bf16.msra.mxu0 %v2187_v61 }
 0x314   :  { %2105 = vmatpush3.bf16.msra.mxu1 %v2187_v61  ;;  %2094 = vmatprep.subr.bf16.mxu0 %v2308_v1 }
 0x315   :  { %2106 = vmatprep.subr.bf16.mxu1 %v2308_v1 }
 0x317   :  { %2095 = vmatpush3.bf16.msra.mxu0 %v2188_v62 }
 0x318   :  { %2107 = vmatpush3.bf16.msra.mxu1 %v2188_v62  ;;  %2096 = vmatprep.subr.bf16.mxu0 %v2308_v1 }
 0x319   :  { %2108 = vmatprep.subr.bf16.mxu1 %v2308_v1 }
 0x31b   :  { %2097 = vmatpush3.bf16.msra.mxu0 %v2189_v63 }
 0x31c   :  { %2109 = vmatpush3.bf16.msra.mxu1 %v2189_v63  ;;  %2114 = vmatprep.subr.bf16.mxu0 %v2308_v1 }
 0x31d   :  { %2126 = vmatprep.subr.bf16.mxu1 %v2308_v1 }
 0x31e   :  { %2099 = vmatmul.mubr.msk.bf16.vlgmr.msra.gmra.mxu0 %vm478_vm4, %v1267_v3 }
 0x31f   :  { %2111 = vmatmul.mubr.msk.bf16.vlgmr.msra.gmra.mxu1 %vm478_vm4, %v1268_v4  ;;  %2122 = vmatprep.mubr.msk.bf16.mxu0 %vm2309_vm1, %v2308_v1 }
 0x320   :  { %2134 = vmatprep.mubr.msk.bf16.mxu1 %vm2309_vm1, %v2308_v1  ;;  %2115 = vmatpush3.bf16.msra.mxu0 %v2190_v5 }
 0x321   :  { %2127 = vmatpush3.bf16.msra.mxu1 %v2190_v5  ;;  %2116 = vmatprep.subr.bf16.mxu0 %v2308_v1 }
 0x322   :  { %2128 = vmatprep.subr.bf16.mxu1 %v2308_v1 }
 0x324   :  { %2117 = vmatpush3.bf16.msra.mxu0 %v2191_v6 }
 0x325   :  { %2129 = vmatpush3.bf16.msra.mxu1 %v2191_v6  ;;  %2118 = vmatprep.subr.bf16.mxu0 %v2308_v1 }
 0x326   :  { %2130 = vmatprep.subr.bf16.mxu1 %v2308_v1 }
 0x328   :  { %2119 = vmatpush3.bf16.msra.mxu0 %v2192_v7 }
 0x329   :  { %2131 = vmatpush3.bf16.msra.mxu1 %v2192_v7  ;;  %2120 = vmatprep.subr.bf16.mxu0 %v2308_v1 }
 0x32a   :  { %2132 = vmatprep.subr.bf16.mxu1 %v2308_v1 }
 0x32c   :  { %2121 = vmatpush3.bf16.msra.mxu0 %v2193_v8 }
 0x32d   :  { %2133 = vmatpush3.bf16.msra.mxu1 %v2193_v8 }
 0x3ce   :  { %v1353_v9 = vpop.f32.mrf.mxu0 }
 0x3cf   :  { %v1396_v10 = vpop.f32.mrf.mxu1 }
 0x3d0   :  { %v2076_v11 = vpop.f32.mrf.mxu0 }
 0x3d1   :  { %v2088_v12 = vpop.f32.mrf.mxu1 }
 0x3d2   :  { %v1356_v13 = vpop.f32.mrf.mxu0 }
 0x3d3   :  { %v1399_v14 = vpop.f32.mrf.mxu1 }
 0x3d4   :  { %v2077_v15 = vpop.f32.mrf.mxu0 }
 0x3d5   :  { %v2089_v16 = vpop.f32.mrf.mxu1 }
 0x3de   :  { %v1463_v17 = vpop.f32.mrf.mxu0 }
 0x3df   :  { %v1464_v1 = vadd.f32 %v1463_v17, %v1353_v9  ;;  %v1506_v19 = vpop.f32.mrf.mxu1 }
 0x3e0   :  { %v1507_v20 = vadd.f32 %v1506_v19, %v1396_v10  ;;  %v2100_v21 = vpop.f32.mrf.mxu0 }
 0x3e1   :  { %v1513_v22 = vadd.f32 %v1512_v18, %v1464_v1  ;;  %v2112_v23 = vpop.f32.mrf.mxu1 }
 0x3e2   :  { %v1514_v24 = vadd.f32 %v1512_v18, %v1507_v20  ;;  %v1466_v25 = vpop.f32.mrf.mxu0 }
 0x3e3   :  { %v1515_v26 = vmax.f32 %v1513_v22, 0.0  ;;  %v1509_v27 = vpop.f32.mrf.mxu1 }
 0x3e4   :  { %v1516_v28 = vmax.f32 %v1514_v24, 0.0  ;;  %v2101_v29 = vpop.f32.mrf.mxu0 }
 0x3e5   :  { %v1517_v30 = vpack.c.bf16 %v1515_v26, %v1515_v26  ;;  %v2113_v31 = vpop.f32.mrf.mxu1 }
 0x3e6   :  { %v1518_v32 = vpack.c.bf16 %v1516_v28, %v1516_v28 }
 0x3e7   :  { %2123 = vmatmul.mubr.msk.bf16.vlgmr.msra.gmra.mxu0 %vm478_vm4, %v1517_v30 }
 0x3e8   :  { %2135 = vmatmul.mubr.msk.bf16.vlgmr.msra.gmra.mxu1 %vm478_vm4, %v1518_v32 }
 0x4a7   :  { %v1589_v34 = vpop.f32.mrf.mxu0 }
 0x4a8   :  { %v1590_v35 = vadd.f32 %v1589_v34, %v1527_v33  ;;  %v1632_v36 = vpop.f32.mrf.mxu1 }
 0x4a9   :  { %v1633_v37 = vadd.f32 %v1632_v36, %v1527_v33  ;;  %v2124_v38 = vpop.f32.mrf.mxu0 }
 0x4aa   :  { %v1638_v39 = vmax.f32 %v1590_v35, 0.0  ;;  %v2136_v40 = vpop.f32.mrf.mxu1 }
 0x4ab   :  { %v1639_v41 = vmax.f32 %v1633_v37, 0.0  ;;  %v1592_v42 = vpop.f32.mrf.mxu0 }
 0x4ac   :  { %v1635_v43 = vpop.f32.mrf.mxu1  ;;  %v1641_v44 = vsel %vm1640_vm7, %v1638_v39, 0.0 }
 0x4ad   :  { %v2125_v45 = vpop.f32.mrf.mxu0  ;;  %v1642_v46 = vsel %vm1640_vm7, %v1639_v41, 0.0 }
 0x4ae   :  { %v2137_v47 = vpop.f32.mrf.mxu1  ;;  %v1643_v48 = vadd.f32 %v1642_v46, %v1641_v44 }
 0x4b0   :  { %1644 = vadd.xlane.f32.xlu0 %v1643_v48 }
 0x539   :  { %v1645_v49 = vpop.xlane.xlu0 %1644 }
 0x53a   :  { %v1646_v50 = vrot.slane %v1645_v49, 4 }
 0x53c   :  { %v1647_v51 = vadd.f32 %v1646_v50, %v1645_v49 }
 0x53e   :  { %v1648_v52 = vrot.slane %v1647_v51, 2 }
 0x540   :  { %v1649_v53 = vadd.f32 %v1648_v52, %v1647_v51 }
 0x542   :  { %v1650_v54 = vrot.slane %v1649_v53, 1 }
 0x544   :  { %v1651_v55 = vadd.f32 %v1650_v54, %v1649_v53 }
 0x546   :  { %2138 = vpush %v1651_v55 }
 0x577   :  { %s2139_s16 = spop %2138 }
 0x578   :  { %v1653_v56 = vstv %s2139_s16 }
 0x579   :  { %1654 = vst [vmem:[#allocation15] sm:$0x1] %v1653_v56 }
 0x57a   :  { %2285 = shalt.err (!%p2282_p10)
}
 0x57b   :  { %1664 = dma.vmem_to_hbm [thread:$0]  %s1662_s9, 16, %s2622_s11, [#allocation9]  }
 0x57c   :  { %2300 = dma.done.wait [#allocation9], 16  }
 0x57d   :  { %2301 = vsyncadd [#allocation9], 4294967280 }
 0x57e   :  { %1668 = vsyncpa [#allocation8], 1 }
 0x57f   :  { %1669 = vsyncpa [#allocation11], 1 }
 0x580   :  { %1670 = vsyncpa [#allocation14], 1 }
 0x581   :  { %1671 = vsyncpa [#allocation9], 1 }

</bundles_post_ra>
